<compile_context>
chip_gen: v6e
topology: v6e:2x2x1
jax: 0.10.0
libtpu: 0.0.40
codegen_flags: <defaults>
</compile_context>

<pallas_src>
import functools

import jax
import jax.numpy as jnp
from jax import lax
from jax.experimental import pallas as pl
from jax.experimental.pallas import tpu as pltpu


# ----------------------------------------------------------------------------
# Pallas kernel: one time chunk (Lt GRU steps) per grid iteration.
# ----------------------------------------------------------------------------
def _gconv_gru_kernel(x_ref, t_ref, wx_ref, wxi_ref, whzr_ref, whzri_ref,
                      whh_ref, whhi_ref, b_ref,
                      states_ref, hfin_ref,
                      xg_ref, h_ref, *, K, N, B, Hd):
    Lt = x_ref.shape[1]
    BN = h_ref.shape[0]
    Hp = h_ref.shape[1]
    Cin = x_ref.shape[-1]

    @pl.when(pl.program_id(0) == 0)
    def _init():
        h_ref[...] = jnp.zeros_like(h_ref)          # H0 = 0 (persistent scratch)

    tmats = t_ref[...]                              # (max(K-1,1), N, N) bf16
    bias = b_ref[...]                               # (1, 3*Hp) f32  (b_x + b_h)

    def cheb_basis0(v0):
        """Lane-concatenated basis [T_0 v | T_1 v | ... | T_{K-1} v] for the
        coupled (batch-0) rows.  The T_k are precomputed, so the K-1 matmuls
        are independent (no serial Chebyshev recurrence on the critical path)."""
        terms = [v0] + [
            jnp.dot(tmats[k], v0, preferred_element_type=jnp.float32)
            .astype(jnp.bfloat16)
            for k in range(K - 1)
        ]
        return jnp.concatenate(terms, axis=-1) if K > 1 else v0

    # ------------------------------------------------------------------
    # Hoisted x-path: gate pre-activations for the WHOLE chunk, computed with
    # batched matmuls before the recurrence and stored to a VMEM scratch.
    # ------------------------------------------------------------------
    x = x_ref[...].astype(jnp.bfloat16)             # (B, Lt, N, Cin)

    # Coupled rows (batch 0): basis rows stacked over time -> one fused matmul
    # with M = Lt*N against the fused [z|r|h] weights.
    rows = [cheb_basis0(x[0, t]) for t in range(Lt)]          # Lt x (N, K*Cin)
    basis0 = jnp.concatenate(rows, axis=0) if Lt > 1 else rows[0]
    g0 = jnp.dot(basis0, wx_ref[...],
                 preferred_element_type=jnp.float32) + bias   # (Lt*N, 3*Hp)
    xg_ref[:, 0:N, :] = g0.reshape(Lt, N, 3 * Hp)

    # Isolated rows (batches 1..B-1): zero Laplacian rows => basis is
    # [v, 0, -v, 0, ...] => one matmul per batch with the folded
    # alternating-sum weights (batched over the whole chunk, M = Lt*N).
    for b in range(1, B):
        gb = jnp.dot(x[b].reshape(Lt * N, Cin), wxi_ref[...],
                     preferred_element_type=jnp.float32) + bias
        xg_ref[:, b * N:(b + 1) * N, :] = gb.reshape(Lt, N, 3 * Hp)

    whzr = whzr_ref[...]                            # (K*Hp, 2*Hp) bf16 [z|r]
    whzri = whzri_ref[...]                          # (Hp, 2*Hp)   bf16 folded
    whh = whh_ref[...]                              # (K*Hp, Hp)   bf16
    whhi = whhi_ref[...]                            # (Hp, Hp)     bf16 folded

    # ------------------------------------------------------------------
    # Recurrence: only the two h-dependent convs remain on the critical path.
    # ------------------------------------------------------------------
    def step(i, h):                                 # h: (BN, Hp) f32
        xg = xg_ref[i]                              # (BN, 3*Hp) f32, precomputed
        hb = h.astype(jnp.bfloat16)

        # z / r gates: coupled rows use the precomputed-T_k basis, isolated
        # rows use the folded weight.
        zr0 = jnp.dot(cheb_basis0(hb[0:N]), whzr,
                      preferred_element_type=jnp.float32)     # (N, 2*Hp)
        if B > 1:
            zr_iso = jnp.dot(hb[N:], whzri, preferred_element_type=jnp.float32)
            zr = jnp.concatenate([zr0, zr_iso], axis=0)
        else:
            zr = zr0
        zr = zr + xg[:, 0:2 * Hp]
        z = jax.nn.sigmoid(zr[:, 0:Hp])
        r = jax.nn.sigmoid(zr[:, Hp:2 * Hp])

        # Candidate state (depends on h*r).
        hr = (h * r).astype(jnp.bfloat16)
        hh0 = jnp.dot(cheb_basis0(hr[0:N]), whh,
                      preferred_element_type=jnp.float32)     # (N, Hp)
        if B > 1:
            hh_iso = jnp.dot(hr[N:], whhi, preferred_element_type=jnp.float32)
            hh = jnp.concatenate([hh0, hh_iso], axis=0)
        else:
            hh = hh0
        h_tilde = jnp.tanh(xg[:, 2 * Hp:3 * Hp] + hh)

        h_new = z * h + (1.0 - z) * h_tilde

        # Store only the real Hd lanes (no padded columns to HBM).
        states_ref[:, pl.ds(i, 1), :, :] = (
            h_new[:, 0:Hd].astype(states_ref.dtype).reshape(B, 1, N, Hd))
        return h_new

    unroll = True if Lt <= 8 else 4                 # bounded unroll for long chunks
    h_last = lax.fori_loop(0, Lt, step, h_ref[...], unroll=unroll)

    h_ref[...] = h_last                             # carry across chunks
    hfin_ref[...] = h_last[:, 0:Hd].reshape(B, N, Hd)


# ----------------------------------------------------------------------------
# Wrapper
# ----------------------------------------------------------------------------
def _pick_vmem_limit():
    """Generation-aware scoped-VMEM budget (review: cap ~48 MiB on v7x,
    raise toward ~100 MiB on v5e/v6e)."""
    try:
        kind = jax.devices()[0].device_kind.lower()
    except Exception:
        kind = ""
    if "v7" in kind:
        return 48 * 1024 * 1024
    if any(v in kind for v in ("v2", "v3", "v4", "v5", "v6")):
        return 100 * 1024 * 1024
    return 48 * 1024 * 1024                          # safe default everywhere


def _pick_time_chunk(L):
    """Largest divisor of L giving >=3 chunks (pipelining), else best effort."""
    best = 1
    for cand in range(1, L + 1):
        if L % cand == 0 and L // cand >= 3:
            best = cand
    return best


def gconv_gru_forward(X, lhat0, params, *, time_chunk=None,
                      states_dtype=jnp.float32):
    """X: (B, L, N, Cin) f32; lhat0: (N, N) f32 scaled Laplacian of the single
    graph (applied to the batch-0 block of the flattened (B*N) node set, exactly
    as the torch module does -- all other flattened rows are isolated nodes).
    Returns (States, H_final) with shapes (B, L, N, Hd) and (B, N, Hd).

    NOTE: `states_dtype=jnp.bfloat16` halves the States writeback (recommended
    on v5e); default f32 matches the torch module's output dtype.
    """
    B, L, N, Cin = X.shape
    K, _, Hd = params['w_x_z'].shape
    BN = B * N
    Hp = pl.cdiv(Hd, 128) * 128                      # lane-dense padded hidden width

    Lt = _pick_time_chunk(L) if time_chunk is None else time_chunk
    # TODO(synk): pad / add a remainder chunk for non-divisor time_chunk values.
    assert L % Lt == 0, "time_chunk must divide the sequence length"
    n_chunks = L // Lt

    # ---- precomputed Chebyshev polynomial matrices T_1..T_{K-1}(L_hat) ------
    if K >= 2:
        Ts = [lhat0]
        t_prev = jnp.eye(N, dtype=jnp.float32)       # T_0
        for _ in range(2, K):
            t_new = 2.0 * (lhat0 @ Ts[-1]) - t_prev
            t_prev = Ts[-1]
            Ts.append(t_new)
        tmats = jnp.stack(Ts).astype(jnp.bfloat16)   # (K-1, N, N)
    else:
        tmats = jnp.zeros((1, N, N), jnp.bfloat16)   # unused placeholder

    # T_k(0) coefficients for the isolated (zero-Laplacian) rows: 1,0,-1,0,...
    c_iso = jnp.array([[1.0, 0.0, -1.0, 0.0][k % 4] for k in range(K)],
                      jnp.float32)

    # ---- wrapper-side weight fusion / padding (done once) -------------------
    def pad_out(w):   # (K, Cin, Hd) -> (K, Cin, Hp)
        return jnp.pad(w, ((0, 0), (0, 0), (0, Hp - w.shape[-1])))

    def pad_io(w):    # (K, Hd, Hd) -> (K, Hp, Hp)
        return jnp.pad(w, ((0, 0), (0, Hp - w.shape[1]), (0, Hp - w.shape[2])))

    wx_cat = jnp.concatenate([pad_out(params['w_x_z']),
                              pad_out(params['w_x_r']),
                              pad_out(params['w_x_h'])], axis=-1)  # (K,Cin,3Hp)
    wx = wx_cat.reshape(K * Cin, 3 * Hp).astype(jnp.bfloat16)
    wx_iso = jnp.einsum('k,kco->co', c_iso, wx_cat).astype(jnp.bfloat16)

    whzr_cat = jnp.concatenate([pad_io(params['w_h_z']),
                                pad_io(params['w_h_r'])], axis=-1)  # (K,Hp,2Hp)
    whzr = whzr_cat.reshape(K * Hp, 2 * Hp).astype(jnp.bfloat16)
    whzr_iso = jnp.einsum('k,kco->co', c_iso, whzr_cat).astype(jnp.bfloat16)

    whh_cat = pad_io(params['w_h_h'])                               # (K,Hp,Hp)
    whh = whh_cat.reshape(K * Hp, Hp).astype(jnp.bfloat16)
    whh_iso = jnp.einsum('k,kco->co', c_iso, whh_cat).astype(jnp.bfloat16)

    def pad_b(b):     # (Hd,) -> (1, Hp)
        return jnp.pad(b, (0, Hp - b.shape[0]))[None, :]

    bias = jnp.concatenate([pad_b(params['b_x_z'] + params['b_h_z']),
                            pad_b(params['b_x_r'] + params['b_h_r']),
                            pad_b(params['b_x_h'] + params['b_h_h'])],
                           axis=-1).astype(jnp.float32)             # (1, 3*Hp)

    kernel = functools.partial(_gconv_gru_kernel, K=K, N=N, B=B, Hd=Hd)

    grid_spec = pltpu.PrefetchScalarGridSpec(
        num_scalar_prefetch=0,
        grid=(n_chunks,),
        in_specs=[
            # X read directly in the caller's (B, L, N, Cin) layout.
            # TODO(synk): pipeline_mode=pl.Buffered(3) here if DMA is exposed.
            pl.BlockSpec((B, Lt, N, Cin), lambda t: (0, t, 0, 0)),
            pl.BlockSpec(tmats.shape, lambda t: (0, 0, 0)),     # T_1..T_{K-1}
            pl.BlockSpec((K * Cin, 3 * Hp), lambda t: (0, 0)),  # fused W_x
            pl.BlockSpec((Cin, 3 * Hp), lambda t: (0, 0)),      # folded iso W_x
            pl.BlockSpec((K * Hp, 2 * Hp), lambda t: (0, 0)),   # fused W_h (z,r)
            pl.BlockSpec((Hp, 2 * Hp), lambda t: (0, 0)),       # folded iso (z,r)
            pl.BlockSpec((K * Hp, Hp), lambda t: (0, 0)),       # W_h (candidate)
            pl.BlockSpec((Hp, Hp), lambda t: (0, 0)),           # folded iso cand.
            pl.BlockSpec((1, 3 * Hp), lambda t: (0, 0)),        # fused bias
        ],
        out_specs=[
            # States written directly in (B, L, N, Hd): no padded columns,
            # no wrapper transpose/slice pass.
            pl.BlockSpec((B, Lt, N, Hd), lambda t: (0, t, 0, 0)),
            pl.BlockSpec((B, N, Hd), lambda t: (0, 0, 0)),      # final H
        ],
        scratch_shapes=[
            pltpu.VMEM((Lt, BN, 3 * Hp), jnp.float32),          # hoisted xg
            pltpu.VMEM((BN, Hp), jnp.float32),                  # carried hidden
        ],
    )

    states, h_final = pl.pallas_call(
        kernel,
        grid_spec=grid_spec,
        out_shape=(
            jax.ShapeDtypeStruct((B, L, N, Hd), states_dtype),
            jax.ShapeDtypeStruct((B, N, Hd), jnp.float32),
        ),
        compiler_params=pltpu.CompilerParams(
            dimension_semantics=("arbitrary",),     # time recurrence is sequential
            vmem_limit_bytes=_pick_vmem_limit(),
        ),
    )(X, tmats, wx, wx_iso, whzr, whzr_iso, whh, whh_iso, bias)

    # TODO(synk): v7x-only further win: add a 'parallel' row-group grid axis so
    # the two TensorCores each carry half the (batch) rows of the recurrence
    # (rows [0:N] stay in group 0); omitted at these tiny demo shapes.
    return states, h_final


# ----------------------------------------------------------------------------
# Graph / parameter setup (plain JAX glue)
# ----------------------------------------------------------------------------
def build_lhat(edge_index, edge_weight, num_nodes, lambda_max=2.0):
    """Batch-0 block of ChebConv.__norm__ ("sym"): 2*L_sym/lambda_max - I.
    Rows of the other batches' (isolated) nodes are identically zero and are
    handled structurally (folded weights) inside the kernel."""
    row, col = edge_index[0], edge_index[1]
    A = jnp.zeros((num_nodes, num_nodes), jnp.float32).at[row, col].add(edge_weight)
    deg = jnp.zeros((num_nodes,), jnp.float32).at[row].add(edge_weight)
    dis = jnp.where(deg > 0, 1.0 / jnp.sqrt(deg), 0.0)
    A_norm = dis[:, None] * A * dis[None, :]
    L = jnp.eye(num_nodes, dtype=jnp.float32) - A_norm
    return (2.0 / lambda_max) * L - jnp.eye(num_nodes, dtype=jnp.float32)


def init_params(key, in_channels, hidden_size, K):
    names_x = ['w_x_z', 'w_x_r', 'w_x_h']
    names_h = ['w_h_z', 'w_h_r', 'w_h_h']
    names_bx = ['b_x_z', 'b_x_r', 'b_x_h']
    names_bh = ['b_h_z', 'b_h_r', 'b_h_h']
    keys = jax.random.split(key, 12)
    params = {}

    def glorot(k, shape):
        fan_in, fan_out = shape[-2], shape[-1]
        s = jnp.sqrt(6.0 / (fan_in + fan_out))
        return jax.random.uniform(k, shape, jnp.float32, -s, s)

    i = 0
    for n in names_x:
        params[n] = glorot(keys[i], (K, in_channels, hidden_size)); i += 1
    for n in names_h:
        params[n] = glorot(keys[i], (K, hidden_size, hidden_size)); i += 1
    for n in names_bx + names_bh:
        params[n] = 0.01 * jax.random.normal(keys[i], (hidden_size,), jnp.float32); i += 1
    return params


# ----------------------------------------------------------------------------
# Pure-JAX f32 reference (same flattened-graph semantics as the torch module)
# ----------------------------------------------------------------------------
def gconv_gru_reference(X, lhat0, params):
    B, L, N, Cin = X.shape
    K, _, Hd = params['w_x_z'].shape
    BN = B * N

    def lmul(t):
        top = lhat0 @ t[:N]
        if BN == N:
            return top
        return jnp.concatenate([top, jnp.zeros((BN - N, t.shape[1]), t.dtype)], 0)

    def cheb(v, w, b):
        out = v @ w[0]
        if K > 1:
            t0, t1 = v, lmul(v)
            out = out + t1 @ w[1]
            for k in range(2, K):
                t2 = 2.0 * lmul(t1) - t0
                out = out + t2 @ w[k]
                t0, t1 = t1, t2
        return out + b

    H = jnp.zeros((BN, Hd), jnp.float32)
    states = []
    for i in range(L):
        x = X[:, i].reshape(BN, Cin)
        z = jax.nn.sigmoid(cheb(x, params['w_x_z'], params['b_x_z'])
                           + cheb(H, params['w_h_z'], params['b_h_z']))
        r = jax.nn.sigmoid(cheb(x, params['w_x_r'], params['b_x_r'])
                           + cheb(H, params['w_h_r'], params['b_h_r']))
        ht = jnp.tanh(cheb(x, params['w_x_h'], params['b_x_h'])
                      + cheb(H * r, params['w_h_h'], params['b_h_h']))
        H = z * H + (1.0 - z) * ht
        states.append(H.reshape(B, N, Hd))
    return jnp.stack(states, axis=1), H.reshape(B, N, Hd)


# ----------------------------------------------------------------------------
if __name__ == "__main__":
    B, L, N, Cin, Hd, K = 2, 8, 16, 4, 32, 3

    key = jax.random.PRNGKey(0)
    k_x, k_w, k_ew = jax.random.split(key, 3)

    # Node features: [Batch x SequenceLen x nodes x in_channels]
    X = jax.random.normal(k_x, (B, L, N, Cin), jnp.float32)

    # Simple undirected ring graph on N nodes with deterministic edge weights.
    src = jnp.arange(N, dtype=jnp.int32)
    dst = (src + 1) % N
    edge_index = jnp.stack([jnp.concatenate([src, dst]),
                            jnp.concatenate([dst, src])], axis=0)   # (2, 2N)
    w_half = jax.random.uniform(k_ew, (N,), jnp.float32, 0.5, 1.5)
    edge_weight = jnp.concatenate([w_half, w_half])                 # symmetric

    lhat0 = build_lhat(edge_index, edge_weight, N, lambda_max=2.0)
    params = init_params(k_w, Cin, Hd, K)

    states, h_final = gconv_gru_forward(X, lhat0, params)
    states, h_final = jax.block_until_ready((states, h_final))

    assert states.shape == (B, L, N, Hd)
    assert h_final.shape == (B, N, Hd)
    assert bool(jnp.all(jnp.isfinite(states))) and bool(jnp.all(jnp.isfinite(h_final)))

    # Loose-tolerance check vs. f32 reference (kernel matmuls run in bf16).
    states_ref, h_ref = gconv_gru_reference(X, lhat0, params)
    assert float(jnp.max(jnp.abs(states.astype(jnp.float32) - states_ref))) < 1e-1
    assert float(jnp.max(jnp.abs(h_final - h_ref))) < 1e-1
    # TODO(synk): dropout_rate is stored by the torch module but never used in forward; omitted.
    print("KERNEL_OK")
</pallas_src>

<mosaic_0001>
module attributes {stable_mosaic.version = 11 : i64} {
  func.func @_gconv_gru_kernel(%arg0: i32, %arg1: memref<2x2x16x4xf32, #tpu.memory_space<vmem>>, %arg2: memref<2x16x16xbf16, #tpu.memory_space<vmem>>, %arg3: memref<12x384xbf16, #tpu.memory_space<vmem>>, %arg4: memref<4x384xbf16, #tpu.memory_space<vmem>>, %arg5: memref<384x256xbf16, #tpu.memory_space<vmem>>, %arg6: memref<128x256xbf16, #tpu.memory_space<vmem>>, %arg7: memref<384x128xbf16, #tpu.memory_space<vmem>>, %arg8: memref<128x128xbf16, #tpu.memory_space<vmem>>, %arg9: memref<1x384xf32, #tpu.memory_space<vmem>>, %arg10: memref<2x2x16x32xf32, #tpu.memory_space<vmem>>, %arg11: memref<2x16x32xf32, #tpu.memory_space<vmem>>, %arg12: memref<2x32x384xf32, #tpu.memory_space<vmem>>, %arg13: memref<32x128xf32, #tpu.memory_space<vmem>>) attributes {dimension_semantics = [#tpu.dimension_semantics<arbitrary>], iteration_bounds = array<i64: 4>, scalar_prefetch = 0 : i64, scratch_operands = 2 : i64, tpu.core_type = #tpu.core_type<tc>, window_params = [{transform_indices = @transform_0, window_bounds = array<i64: 2, 2, 16, 4>}, {pipeline_mode = #tpu.pipeline_mode<synchronous>, transform_indices = @transform_1, window_bounds = array<i64: 2, 16, 16>}, {pipeline_mode = #tpu.pipeline_mode<synchronous>, transform_indices = @transform_2, window_bounds = array<i64: 12, 384>}, {pipeline_mode = #tpu.pipeline_mode<synchronous>, transform_indices = @transform_3, window_bounds = array<i64: 4, 384>}, {pipeline_mode = #tpu.pipeline_mode<synchronous>, transform_indices = @transform_4, window_bounds = array<i64: 384, 256>}, {pipeline_mode = #tpu.pipeline_mode<synchronous>, transform_indices = @transform_5, window_bounds = array<i64: 128, 256>}, {pipeline_mode = #tpu.pipeline_mode<synchronous>, transform_indices = @transform_6, window_bounds = array<i64: 384, 128>}, {pipeline_mode = #tpu.pipeline_mode<synchronous>, transform_indices = @transform_7, window_bounds = array<i64: 128, 128>}, {pipeline_mode = #tpu.pipeline_mode<synchronous>, transform_indices = @transform_8, window_bounds = array<i64: 1, 384>}, {transform_indices = @transform_9, window_bounds = array<i64: 2, 2, 16, 32>}, {pipeline_mode = #tpu.pipeline_mode<synchronous>, transform_indices = @transform_10, window_bounds = array<i64: 2, 16, 32>}]} {
    %c0_i32 = arith.constant 0 : i32
    %0 = arith.cmpi eq, %arg0, %c0_i32 : i32
    %1 = arith.extui %0 : i1 to i32
    %c0_i32_0 = arith.constant 0 : i32
    %2 = arith.cmpi ne, %1, %c0_i32_0 : i32
    scf.if %2 {
      %cst_71 = arith.constant 0.000000e+00 : f32
      %174 = vector.broadcast %cst_71 : f32 to vector<32x128xf32>
      %c0_72 = arith.constant 0 : index
      %c0_73 = arith.constant 0 : index
      %175 = vector.load %arg13[%c0_72, %c0_73] : memref<32x128xf32, #tpu.memory_space<vmem>>, vector<32x128xf32>
      tpu.vector_store %arg13[%c0_72, %c0_73], %174 {strides = array<i32>} : memref<32x128xf32, #tpu.memory_space<vmem>>, vector<32x128xf32>,
    } else {
    }
    %c0 = arith.constant 0 : index
    %c0_1 = arith.constant 0 : index
    %c0_2 = arith.constant 0 : index
    %3 = vector.load %arg2[%c0, %c0_1, %c0_2] : memref<2x16x16xbf16, #tpu.memory_space<vmem>>, vector<2x16x16xbf16>
    %c0_3 = arith.constant 0 : index
    %c0_4 = arith.constant 0 : index
    %4 = vector.load %arg9[%c0_3, %c0_4] : memref<1x384xf32, #tpu.memory_space<vmem>>, vector<1x384xf32>
    %c0_5 = arith.constant 0 : index
    %c0_6 = arith.constant 0 : index
    %c0_7 = arith.constant 0 : index
    %c0_8 = arith.constant 0 : index
    %5 = vector.load %arg1[%c0_5, %c0_6, %c0_7, %c0_8] : memref<2x2x16x4xf32, #tpu.memory_space<vmem>>, vector<2x2x16x4xf32>
    %6 = arith.truncf %5 : vector<2x2x16x4xf32> to vector<2x2x16x4xbf16>
    %7 = vector.extract_strided_slice %6 {offsets = [0, 0, 0, 0], sizes = [1, 1, 16, 4], strides = [1, 1, 1, 1]} : vector<2x2x16x4xbf16> to vector<1x1x16x4xbf16>
    %8 = vector.shape_cast %7 : vector<1x1x16x4xbf16> to vector<16x4xbf16>
    %9 = vector.extract_strided_slice %3 {offsets = [0, 0, 0], sizes = [1, 16, 16], strides = [1, 1, 1]} : vector<2x16x16xbf16> to vector<1x16x16xbf16>
    %10 = vector.shape_cast %9 : vector<1x16x16xbf16> to vector<16x16xbf16>
    %cst = arith.constant dense<0.000000e+00> : vector<16x4xf32>
    %11 = tpu.matmul %10, %8, %cst {dimension_numbers = #tpu.dot_dimension_numbers<[1], [0], [0], [1], [0, 0, 1, 1], [], []>} : vector<16x16xbf16>, vector<16x4xbf16>, vector<16x4xf32> -> vector<16x4xf32>
    %12 = arith.truncf %11 : vector<16x4xf32> to vector<16x4xbf16>
    %13 = vector.extract_strided_slice %3 {offsets = [1, 0, 0], sizes = [1, 16, 16], strides = [1, 1, 1]} : vector<2x16x16xbf16> to vector<1x16x16xbf16>
    %14 = vector.shape_cast %13 : vector<1x16x16xbf16> to vector<16x16xbf16>
    %cst_9 = arith.constant dense<0.000000e+00> : vector<16x4xf32>
    %15 = tpu.matmul %14, %8, %cst_9 {dimension_numbers = #tpu.dot_dimension_numbers<[1], [0], [0], [1], [0, 0, 1, 1], [], []>} : vector<16x16xbf16>, vector<16x4xbf16>, vector<16x4xf32> -> vector<16x4xf32>
    %16 = arith.truncf %15 : vector<16x4xf32> to vector<16x4xbf16>
    %17 = tpu.concatenate %8, %12, %16 in 1 : vector<16x4xbf16>, vector<16x4xbf16>, vector<16x4xbf16> -> vector<16x12xbf16>
    %18 = vector.extract_strided_slice %6 {offsets = [0, 1, 0, 0], sizes = [1, 1, 16, 4], strides = [1, 1, 1, 1]} : vector<2x2x16x4xbf16> to vector<1x1x16x4xbf16>
    %19 = vector.shape_cast %18 : vector<1x1x16x4xbf16> to vector<16x4xbf16>
    %20 = vector.extract_strided_slice %3 {offsets = [0, 0, 0], sizes = [1, 16, 16], strides = [1, 1, 1]} : vector<2x16x16xbf16> to vector<1x16x16xbf16>
    %21 = vector.shape_cast %20 : vector<1x16x16xbf16> to vector<16x16xbf16>
    %cst_10 = arith.constant dense<0.000000e+00> : vector<16x4xf32>
    %22 = tpu.matmul %21, %19, %cst_10 {dimension_numbers = #tpu.dot_dimension_numbers<[1], [0], [0], [1], [0, 0, 1, 1], [], []>} : vector<16x16xbf16>, vector<16x4xbf16>, vector<16x4xf32> -> vector<16x4xf32>
    %23 = arith.truncf %22 : vector<16x4xf32> to vector<16x4xbf16>
    %24 = vector.extract_strided_slice %3 {offsets = [1, 0, 0], sizes = [1, 16, 16], strides = [1, 1, 1]} : vector<2x16x16xbf16> to vector<1x16x16xbf16>
    %25 = vector.shape_cast %24 : vector<1x16x16xbf16> to vector<16x16xbf16>
    %cst_11 = arith.constant dense<0.000000e+00> : vector<16x4xf32>
    %26 = tpu.matmul %25, %19, %cst_11 {dimension_numbers = #tpu.dot_dimension_numbers<[1], [0], [0], [1], [0, 0, 1, 1], [], []>} : vector<16x16xbf16>, vector<16x4xbf16>, vector<16x4xf32> -> vector<16x4xf32>
    %27 = arith.truncf %26 : vector<16x4xf32> to vector<16x4xbf16>
    %28 = tpu.concatenate %19, %23, %27 in 1 : vector<16x4xbf16>, vector<16x4xbf16>, vector<16x4xbf16> -> vector<16x12xbf16>
    %29 = tpu.concatenate %17, %28 in 0 : vector<16x12xbf16>, vector<16x12xbf16> -> vector<32x12xbf16>
    %c0_12 = arith.constant 0 : index
    %c0_13 = arith.constant 0 : index
    %30 = vector.load %arg3[%c0_12, %c0_13] : memref<12x384xbf16, #tpu.memory_space<vmem>>, vector<12x384xbf16>
    %cst_14 = arith.constant dense<0.000000e+00> : vector<32x384xf32>
    %31 = tpu.matmul %29, %30, %cst_14 {dimension_numbers = #tpu.dot_dimension_numbers<[1], [0], [0], [1], [0, 0, 1, 1], [], []>} : vector<32x12xbf16>, vector<12x384xbf16>, vector<32x384xf32> -> vector<32x384xf32>
    %32 = vector.broadcast %4 : vector<1x384xf32> to vector<32x384xf32>
    %33 = arith.addf %31, %32 : vector<32x384xf32>
    %34 = vector.shape_cast %33 : vector<32x384xf32> to vector<2x16x384xf32>
    %c0_15 = arith.constant 0 : index
    %c0_16 = arith.constant 0 : index
    %c0_17 = arith.constant 0 : index
    %35 = vector.load %arg12[%c0_15, %c0_16, %c0_17] : memref<2x32x384xf32, #tpu.memory_space<vmem>>, vector<2x16x384xf32>
    tpu.vector_store %arg12[%c0_15, %c0_16, %c0_17], %34 {strides = array<i32>} : memref<2x32x384xf32, #tpu.memory_space<vmem>>, vector<2x16x384xf32>,
    %36 = vector.extract_strided_slice %6 {offsets = [1, 0, 0, 0], sizes = [1, 2, 16, 4], strides = [1, 1, 1, 1]} : vector<2x2x16x4xbf16> to vector<1x2x16x4xbf16>
    %37 = vector.shape_cast %36 : vector<1x2x16x4xbf16> to vector<2x16x4xbf16>
    %38 = vector.shape_cast %37 : vector<2x16x4xbf16> to vector<32x4xbf16>
    %c0_18 = arith.constant 0 : index
    %c0_19 = arith.constant 0 : index
    %39 = vector.load %arg4[%c0_18, %c0_19] : memref<4x384xbf16, #tpu.memory_space<vmem>>, vector<4x384xbf16>
    %cst_20 = arith.constant dense<0.000000e+00> : vector<32x384xf32>
    %40 = tpu.matmul %38, %39, %cst_20 {dimension_numbers = #tpu.dot_dimension_numbers<[1], [0], [0], [1], [0, 0, 1, 1], [], []>} : vector<32x4xbf16>, vector<4x384xbf16>, vector<32x384xf32> -> vector<32x384xf32>
    %41 = vector.broadcast %4 : vector<1x384xf32> to vector<32x384xf32>
    %42 = arith.addf %40, %41 : vector<32x384xf32>
    %43 = vector.shape_cast %42 : vector<32x384xf32> to vector<2x16x384xf32>
    %c0_21 = arith.constant 0 : index
    %c16 = arith.constant 16 : index
    %c0_22 = arith.constant 0 : index
    %44 = vector.load %arg12[%c0_21, %c16, %c0_22] : memref<2x32x384xf32, #tpu.memory_space<vmem>>, vector<2x16x384xf32>
    tpu.vector_store %arg12[%c0_21, %c16, %c0_22], %43 {strides = array<i32>} : memref<2x32x384xf32, #tpu.memory_space<vmem>>, vector<2x16x384xf32>,
    %c0_23 = arith.constant 0 : index
    %c0_24 = arith.constant 0 : index
    %45 = vector.load %arg5[%c0_23, %c0_24] : memref<384x256xbf16, #tpu.memory_space<vmem>>, vector<384x256xbf16>
    %c0_25 = arith.constant 0 : index
    %c0_26 = arith.constant 0 : index
    %46 = vector.load %arg6[%c0_25, %c0_26] : memref<128x256xbf16, #tpu.memory_space<vmem>>, vector<128x256xbf16>
    %c0_27 = arith.constant 0 : index
    %c0_28 = arith.constant 0 : index
    %47 = vector.load %arg7[%c0_27, %c0_28] : memref<384x128xbf16, #tpu.memory_space<vmem>>, vector<384x128xbf16>
    %c0_29 = arith.constant 0 : index
    %c0_30 = arith.constant 0 : index
    %48 = vector.load %arg8[%c0_29, %c0_30] : memref<128x128xbf16, #tpu.memory_space<vmem>>, vector<128x128xbf16>
    %c0_31 = arith.constant 0 : index
    %c0_32 = arith.constant 0 : index
    %49 = vector.load %arg13[%c0_31, %c0_32] : memref<32x128xf32, #tpu.memory_space<vmem>>, vector<32x128xf32>
    %c0_i32_33 = arith.constant 0 : i32
    %50 = arith.index_cast %c0_i32_33 : i32 to index
    %c0_34 = arith.constant 0 : index
    %c0_35 = arith.constant 0 : index
    %51 = vector.load %arg12[%50, %c0_34, %c0_35] : memref<2x32x384xf32, #tpu.memory_space<vmem>>, vector<1x32x384xf32>
    %52 = vector.shape_cast %51 : vector<1x32x384xf32> to vector<32x384xf32>
    %53 = arith.truncf %49 : vector<32x128xf32> to vector<32x128xbf16>
    %54 = vector.extract_strided_slice %53 {offsets = [0, 0], sizes = [16, 128], strides = [1, 1]} : vector<32x128xbf16> to vector<16x128xbf16>
    %55 = vector.extract_strided_slice %3 {offsets = [0, 0, 0], sizes = [1, 16, 16], strides = [1, 1, 1]} : vector<2x16x16xbf16> to vector<1x16x16xbf16>
    %56 = vector.shape_cast %55 : vector<1x16x16xbf16> to vector<16x16xbf16>
    %cst_36 = arith.constant dense<0.000000e+00> : vector<16x128xf32>
    %57 = tpu.matmul %56, %54, %cst_36 {dimension_numbers = #tpu.dot_dimension_numbers<[1], [0], [0], [1], [0, 0, 1, 1], [], []>} : vector<16x16xbf16>, vector<16x128xbf16>, vector<16x128xf32> -> vector<16x128xf32>
    %58 = arith.truncf %57 : vector<16x128xf32> to vector<16x128xbf16>
    %59 = vector.extract_strided_slice %3 {offsets = [1, 0, 0], sizes = [1, 16, 16], strides = [1, 1, 1]} : vector<2x16x16xbf16> to vector<1x16x16xbf16>
    %60 = vector.shape_cast %59 : vector<1x16x16xbf16> to vector<16x16xbf16>
    %cst_37 = arith.constant dense<0.000000e+00> : vector<16x128xf32>
    %61 = tpu.matmul %60, %54, %cst_37 {dimension_numbers = #tpu.dot_dimension_numbers<[1], [0], [0], [1], [0, 0, 1, 1], [], []>} : vector<16x16xbf16>, vector<16x128xbf16>, vector<16x128xf32> -> vector<16x128xf32>
    %62 = arith.truncf %61 : vector<16x128xf32> to vector<16x128xbf16>
    %63 = tpu.concatenate %54, %58, %62 in 1 : vector<16x128xbf16>, vector<16x128xbf16>, vector<16x128xbf16> -> vector<16x384xbf16>
    %cst_38 = arith.constant dense<0.000000e+00> : vector<16x256xf32>
    %64 = tpu.matmul %63, %45, %cst_38 {dimension_numbers = #tpu.dot_dimension_numbers<[1], [0], [0], [1], [0, 0, 1, 1], [], []>} : vector<16x384xbf16>, vector<384x256xbf16>, vector<16x256xf32> -> vector<16x256xf32>
    %65 = vector.extract_strided_slice %53 {offsets = [16, 0], sizes = [16, 128], strides = [1, 1]} : vector<32x128xbf16> to vector<16x128xbf16>
    %cst_39 = arith.constant dense<0.000000e+00> : vector<16x256xf32>
    %66 = tpu.matmul %65, %46, %cst_39 {dimension_numbers = #tpu.dot_dimension_numbers<[1], [0], [0], [1], [0, 0, 1, 1], [], []>} : vector<16x128xbf16>, vector<128x256xbf16>, vector<16x256xf32> -> vector<16x256xf32>
    %67 = tpu.concatenate %64, %66 in 0 : vector<16x256xf32>, vector<16x256xf32> -> vector<32x256xf32>
    %68 = vector.extract_strided_slice %52 {offsets = [0, 0], sizes = [32, 256], strides = [1, 1]} : vector<32x384xf32> to vector<32x256xf32>
    %69 = arith.addf %67, %68 : vector<32x256xf32>
    %70 = vector.extract_strided_slice %69 {offsets = [0, 0], sizes = [32, 128], strides = [1, 1]} : vector<32x256xf32> to vector<32x128xf32>
    %71 = arith.negf %70 : vector<32x128xf32>
    %72 = math.exp %71 : vector<32x128xf32>
    %cst_40 = arith.constant 1.000000e+00 : f32
    %73 = vector.broadcast %cst_40 : f32 to vector<32x128xf32>
    %74 = arith.addf %73, %72 : vector<32x128xf32>
    %75 = arith.divf %73, %74 : vector<32x128xf32>
    %76 = vector.extract_strided_slice %69 {offsets = [0, 128], sizes = [32, 128], strides = [1, 1]} : vector<32x256xf32> to vector<32x128xf32>
    %77 = arith.negf %76 : vector<32x128xf32>
    %78 = math.exp %77 : vector<32x128xf32>
    %cst_41 = arith.constant 1.000000e+00 : f32
    %79 = vector.broadcast %cst_41 : f32 to vector<32x128xf32>
    %80 = arith.addf %79, %78 : vector<32x128xf32>
    %81 = arith.divf %79, %80 : vector<32x128xf32>
    %82 = arith.mulf %49, %81 : vector<32x128xf32>
    %83 = arith.truncf %82 : vector<32x128xf32> to vector<32x128xbf16>
    %84 = vector.extract_strided_slice %83 {offsets = [0, 0], sizes = [16, 128], strides = [1, 1]} : vector<32x128xbf16> to vector<16x128xbf16>
    %85 = vector.extract_strided_slice %3 {offsets = [0, 0, 0], sizes = [1, 16, 16], strides = [1, 1, 1]} : vector<2x16x16xbf16> to vector<1x16x16xbf16>
    %86 = vector.shape_cast %85 : vector<1x16x16xbf16> to vector<16x16xbf16>
    %cst_42 = arith.constant dense<0.000000e+00> : vector<16x128xf32>
    %87 = tpu.matmul %86, %84, %cst_42 {dimension_numbers = #tpu.dot_dimension_numbers<[1], [0], [0], [1], [0, 0, 1, 1], [], []>} : vector<16x16xbf16>, vector<16x128xbf16>, vector<16x128xf32> -> vector<16x128xf32>
    %88 = arith.truncf %87 : vector<16x128xf32> to vector<16x128xbf16>
    %89 = vector.extract_strided_slice %3 {offsets = [1, 0, 0], sizes = [1, 16, 16], strides = [1, 1, 1]} : vector<2x16x16xbf16> to vector<1x16x16xbf16>
    %90 = vector.shape_cast %89 : vector<1x16x16xbf16> to vector<16x16xbf16>
    %cst_43 = arith.constant dense<0.000000e+00> : vector<16x128xf32>
    %91 = tpu.matmul %90, %84, %cst_43 {dimension_numbers = #tpu.dot_dimension_numbers<[1], [0], [0], [1], [0, 0, 1, 1], [], []>} : vector<16x16xbf16>, vector<16x128xbf16>, vector<16x128xf32> -> vector<16x128xf32>
    %92 = arith.truncf %91 : vector<16x128xf32> to vector<16x128xbf16>
    %93 = tpu.concatenate %84, %88, %92 in 1 : vector<16x128xbf16>, vector<16x128xbf16>, vector<16x128xbf16> -> vector<16x384xbf16>
    %cst_44 = arith.constant dense<0.000000e+00> : vector<16x128xf32>
    %94 = tpu.matmul %93, %47, %cst_44 {dimension_numbers = #tpu.dot_dimension_numbers<[1], [0], [0], [1], [0, 0, 1, 1], [], []>} : vector<16x384xbf16>, vector<384x128xbf16>, vector<16x128xf32> -> vector<16x128xf32>
    %95 = vector.extract_strided_slice %83 {offsets = [16, 0], sizes = [16, 128], strides = [1, 1]} : vector<32x128xbf16> to vector<16x128xbf16>
    %cst_45 = arith.constant dense<0.000000e+00> : vector<16x128xf32>
    %96 = tpu.matmul %95, %48, %cst_45 {dimension_numbers = #tpu.dot_dimension_numbers<[1], [0], [0], [1], [0, 0, 1, 1], [], []>} : vector<16x128xbf16>, vector<128x128xbf16>, vector<16x128xf32> -> vector<16x128xf32>
    %97 = tpu.concatenate %94, %96 in 0 : vector<16x128xf32>, vector<16x128xf32> -> vector<32x128xf32>
    %98 = vector.extract_strided_slice %52 {offsets = [0, 256], sizes = [32, 128], strides = [1, 1]} : vector<32x384xf32> to vector<32x128xf32>
    %99 = arith.addf %98, %97 : vector<32x128xf32>
    %100 = math.tanh %99 : vector<32x128xf32>
    %101 = arith.mulf %75, %49 : vector<32x128xf32>
    %cst_46 = arith.constant 1.000000e+00 : f32
    %102 = vector.broadcast %cst_46 : f32 to vector<32x128xf32>
    %103 = arith.subf %102, %75 : vector<32x128xf32>
    %104 = arith.mulf %103, %100 : vector<32x128xf32>
    %105 = arith.addf %101, %104 : vector<32x128xf32>
    %106 = vector.extract_strided_slice %105 {offsets = [0, 0], sizes = [32, 32], strides = [1, 1]} : vector<32x128xf32> to vector<32x32xf32>
    %107 = vector.shape_cast %106 : vector<32x32xf32> to vector<2x1x16x32xf32>
    %c0_47 = arith.constant 0 : index
    %108 = arith.index_cast %c0_i32_33 : i32 to index
    %c0_48 = arith.constant 0 : index
    %c0_49 = arith.constant 0 : index
    %109 = vector.load %arg10[%c0_47, %108, %c0_48, %c0_49] : memref<2x2x16x32xf32, #tpu.memory_space<vmem>>, vector<2x1x16x32xf32>
    tpu.vector_store %arg10[%c0_47, %108, %c0_48, %c0_49], %107 {strides = array<i32>} : memref<2x2x16x32xf32, #tpu.memory_space<vmem>>, vector<2x1x16x32xf32>,
    %c1_i32 = arith.constant 1 : i32
    %110 = arith.index_cast %c1_i32 : i32 to index
    %c0_50 = arith.constant 0 : index
    %c0_51 = arith.constant 0 : index
    %111 = vector.load %arg12[%110, %c0_50, %c0_51] : memref<2x32x384xf32, #tpu.memory_space<vmem>>, vector<1x32x384xf32>
    %112 = vector.shape_cast %111 : vector<1x32x384xf32> to vector<32x384xf32>
    %113 = arith.truncf %105 : vector<32x128xf32> to vector<32x128xbf16>
    %114 = vector.extract_strided_slice %113 {offsets = [0, 0], sizes = [16, 128], strides = [1, 1]} : vector<32x128xbf16> to vector<16x128xbf16>
    %115 = vector.extract_strided_slice %3 {offsets = [0, 0, 0], sizes = [1, 16, 16], strides = [1, 1, 1]} : vector<2x16x16xbf16> to vector<1x16x16xbf16>
    %116 = vector.shape_cast %115 : vector<1x16x16xbf16> to vector<16x16xbf16>
    %cst_52 = arith.constant dense<0.000000e+00> : vector<16x128xf32>
    %117 = tpu.matmul %116, %114, %cst_52 {dimension_numbers = #tpu.dot_dimension_numbers<[1], [0], [0], [1], [0, 0, 1, 1], [], []>} : vector<16x16xbf16>, vector<16x128xbf16>, vector<16x128xf32> -> vector<16x128xf32>
    %118 = arith.truncf %117 : vector<16x128xf32> to vector<16x128xbf16>
    %119 = vector.extract_strided_slice %3 {offsets = [1, 0, 0], sizes = [1, 16, 16], strides = [1, 1, 1]} : vector<2x16x16xbf16> to vector<1x16x16xbf16>
    %120 = vector.shape_cast %119 : vector<1x16x16xbf16> to vector<16x16xbf16>
    %cst_53 = arith.constant dense<0.000000e+00> : vector<16x128xf32>
    %121 = tpu.matmul %120, %114, %cst_53 {dimension_numbers = #tpu.dot_dimension_numbers<[1], [0], [0], [1], [0, 0, 1, 1], [], []>} : vector<16x16xbf16>, vector<16x128xbf16>, vector<16x128xf32> -> vector<16x128xf32>
    %122 = arith.truncf %121 : vector<16x128xf32> to vector<16x128xbf16>
    %123 = tpu.concatenate %114, %118, %122 in 1 : vector<16x128xbf16>, vector<16x128xbf16>, vector<16x128xbf16> -> vector<16x384xbf16>
    %cst_54 = arith.constant dense<0.000000e+00> : vector<16x256xf32>
    %124 = tpu.matmul %123, %45, %cst_54 {dimension_numbers = #tpu.dot_dimension_numbers<[1], [0], [0], [1], [0, 0, 1, 1], [], []>} : vector<16x384xbf16>, vector<384x256xbf16>, vector<16x256xf32> -> vector<16x256xf32>
    %125 = vector.extract_strided_slice %113 {offsets = [16, 0], sizes = [16, 128], strides = [1, 1]} : vector<32x128xbf16> to vector<16x128xbf16>
    %cst_55 = arith.constant dense<0.000000e+00> : vector<16x256xf32>
    %126 = tpu.matmul %125, %46, %cst_55 {dimension_numbers = #tpu.dot_dimension_numbers<[1], [0], [0], [1], [0, 0, 1, 1], [], []>} : vector<16x128xbf16>, vector<128x256xbf16>, vector<16x256xf32> -> vector<16x256xf32>
    %127 = tpu.concatenate %124, %126 in 0 : vector<16x256xf32>, vector<16x256xf32> -> vector<32x256xf32>
    %128 = vector.extract_strided_slice %112 {offsets = [0, 0], sizes = [32, 256], strides = [1, 1]} : vector<32x384xf32> to vector<32x256xf32>
    %129 = arith.addf %127, %128 : vector<32x256xf32>
    %130 = vector.extract_strided_slice %129 {offsets = [0, 0], sizes = [32, 128], strides = [1, 1]} : vector<32x256xf32> to vector<32x128xf32>
    %131 = arith.negf %130 : vector<32x128xf32>
    %132 = math.exp %131 : vector<32x128xf32>
    %cst_56 = arith.constant 1.000000e+00 : f32
    %133 = vector.broadcast %cst_56 : f32 to vector<32x128xf32>
    %134 = arith.addf %133, %132 : vector<32x128xf32>
    %135 = arith.divf %133, %134 : vector<32x128xf32>
    %136 = vector.extract_strided_slice %129 {offsets = [0, 128], sizes = [32, 128], strides = [1, 1]} : vector<32x256xf32> to vector<32x128xf32>
    %137 = arith.negf %136 : vector<32x128xf32>
    %138 = math.exp %137 : vector<32x128xf32>
    %cst_57 = arith.constant 1.000000e+00 : f32
    %139 = vector.broadcast %cst_57 : f32 to vector<32x128xf32>
    %140 = arith.addf %139, %138 : vector<32x128xf32>
    %141 = arith.divf %139, %140 : vector<32x128xf32>
    %142 = arith.mulf %105, %141 : vector<32x128xf32>
    %143 = arith.truncf %142 : vector<32x128xf32> to vector<32x128xbf16>
    %144 = vector.extract_strided_slice %143 {offsets = [0, 0], sizes = [16, 128], strides = [1, 1]} : vector<32x128xbf16> to vector<16x128xbf16>
    %145 = vector.extract_strided_slice %3 {offsets = [0, 0, 0], sizes = [1, 16, 16], strides = [1, 1, 1]} : vector<2x16x16xbf16> to vector<1x16x16xbf16>
    %146 = vector.shape_cast %145 : vector<1x16x16xbf16> to vector<16x16xbf16>
    %cst_58 = arith.constant dense<0.000000e+00> : vector<16x128xf32>
    %147 = tpu.matmul %146, %144, %cst_58 {dimension_numbers = #tpu.dot_dimension_numbers<[1], [0], [0], [1], [0, 0, 1, 1], [], []>} : vector<16x16xbf16>, vector<16x128xbf16>, vector<16x128xf32> -> vector<16x128xf32>
    %148 = arith.truncf %147 : vector<16x128xf32> to vector<16x128xbf16>
    %149 = vector.extract_strided_slice %3 {offsets = [1, 0, 0], sizes = [1, 16, 16], strides = [1, 1, 1]} : vector<2x16x16xbf16> to vector<1x16x16xbf16>
    %150 = vector.shape_cast %149 : vector<1x16x16xbf16> to vector<16x16xbf16>
    %cst_59 = arith.constant dense<0.000000e+00> : vector<16x128xf32>
    %151 = tpu.matmul %150, %144, %cst_59 {dimension_numbers = #tpu.dot_dimension_numbers<[1], [0], [0], [1], [0, 0, 1, 1], [], []>} : vector<16x16xbf16>, vector<16x128xbf16>, vector<16x128xf32> -> vector<16x128xf32>
    %152 = arith.truncf %151 : vector<16x128xf32> to vector<16x128xbf16>
    %153 = tpu.concatenate %144, %148, %152 in 1 : vector<16x128xbf16>, vector<16x128xbf16>, vector<16x128xbf16> -> vector<16x384xbf16>
    %cst_60 = arith.constant dense<0.000000e+00> : vector<16x128xf32>
    %154 = tpu.matmul %153, %47, %cst_60 {dimension_numbers = #tpu.dot_dimension_numbers<[1], [0], [0], [1], [0, 0, 1, 1], [], []>} : vector<16x384xbf16>, vector<384x128xbf16>, vector<16x128xf32> -> vector<16x128xf32>
    %155 = vector.extract_strided_slice %143 {offsets = [16, 0], sizes = [16, 128], strides = [1, 1]} : vector<32x128xbf16> to vector<16x128xbf16>
    %cst_61 = arith.constant dense<0.000000e+00> : vector<16x128xf32>
    %156 = tpu.matmul %155, %48, %cst_61 {dimension_numbers = #tpu.dot_dimension_numbers<[1], [0], [0], [1], [0, 0, 1, 1], [], []>} : vector<16x128xbf16>, vector<128x128xbf16>, vector<16x128xf32> -> vector<16x128xf32>
    %157 = tpu.concatenate %154, %156 in 0 : vector<16x128xf32>, vector<16x128xf32> -> vector<32x128xf32>
    %158 = vector.extract_strided_slice %112 {offsets = [0, 256], sizes = [32, 128], strides = [1, 1]} : vector<32x384xf32> to vector<32x128xf32>
    %159 = arith.addf %158, %157 : vector<32x128xf32>
    %160 = math.tanh %159 : vector<32x128xf32>
    %161 = arith.mulf %135, %105 : vector<32x128xf32>
    %cst_62 = arith.constant 1.000000e+00 : f32
    %162 = vector.broadcast %cst_62 : f32 to vector<32x128xf32>
    %163 = arith.subf %162, %135 : vector<32x128xf32>
    %164 = arith.mulf %163, %160 : vector<32x128xf32>
    %165 = arith.addf %161, %164 : vector<32x128xf32>
    %166 = vector.extract_strided_slice %165 {offsets = [0, 0], sizes = [32, 32], strides = [1, 1]} : vector<32x128xf32> to vector<32x32xf32>
    %167 = vector.shape_cast %166 : vector<32x32xf32> to vector<2x1x16x32xf32>
    %c0_63 = arith.constant 0 : index
    %168 = arith.index_cast %c1_i32 : i32 to index
    %c0_64 = arith.constant 0 : index
    %c0_65 = arith.constant 0 : index
    %169 = vector.load %arg10[%c0_63, %168, %c0_64, %c0_65] : memref<2x2x16x32xf32, #tpu.memory_space<vmem>>, vector<2x1x16x32xf32>
    tpu.vector_store %arg10[%c0_63, %168, %c0_64, %c0_65], %167 {strides = array<i32>} : memref<2x2x16x32xf32, #tpu.memory_space<vmem>>, vector<2x1x16x32xf32>,
    %c2_i32 = arith.constant 2 : i32
    %c0_66 = arith.constant 0 : index
    %c0_67 = arith.constant 0 : index
    %170 = vector.load %arg13[%c0_66, %c0_67] : memref<32x128xf32, #tpu.memory_space<vmem>>, vector<32x128xf32>
    tpu.vector_store %arg13[%c0_66, %c0_67], %165 {strides = array<i32>} : memref<32x128xf32, #tpu.memory_space<vmem>>, vector<32x128xf32>,
    %171 = vector.extract_strided_slice %165 {offsets = [0, 0], sizes = [32, 32], strides = [1, 1]} : vector<32x128xf32> to vector<32x32xf32>
    %172 = vector.shape_cast %171 : vector<32x32xf32> to vector<2x16x32xf32>
    %c0_68 = arith.constant 0 : index
    %c0_69 = arith.constant 0 : index
    %c0_70 = arith.constant 0 : index
    %173 = vector.load %arg11[%c0_68, %c0_69, %c0_70] : memref<2x16x32xf32, #tpu.memory_space<vmem>>, vector<2x16x32xf32>
    tpu.vector_store %arg11[%c0_68, %c0_69, %c0_70], %172 {strides = array<i32>} : memref<2x16x32xf32, #tpu.memory_space<vmem>>, vector<2x16x32xf32>,
    return
  }
  func.func @transform_0(%arg0: i32) -> (i32, i32, i32, i32) {
    %c0_i32 = arith.constant 0 : i32
    %c0_i32_0 = arith.constant 0 : i32
    %c0_i32_1 = arith.constant 0 : i32
    %c0_i32_2 = arith.constant 0 : i32
    return %c0_i32, %arg0, %c0_i32_0, %c0_i32_1 : i32, i32, i32, i32
  }
  func.func @transform_1(%arg0: i32) -> (i32, i32, i32) {
    %c0_i32 = arith.constant 0 : i32
    %c0_i32_0 = arith.constant 0 : i32
    %c0_i32_1 = arith.constant 0 : i32
    %c0_i32_2 = arith.constant 0 : i32
    return %c0_i32, %c0_i32_0, %c0_i32_1 : i32, i32, i32
  }
  func.func @transform_2(%arg0: i32) -> (i32, i32) {
    %c0_i32 = arith.constant 0 : i32
    %c0_i32_0 = arith.constant 0 : i32
    %c0_i32_1 = arith.constant 0 : i32
    return %c0_i32, %c0_i32_0 : i32, i32
  }
  func.func @transform_3(%arg0: i32) -> (i32, i32) {
    %c0_i32 = arith.constant 0 : i32
    %c0_i32_0 = arith.constant 0 : i32
    %c0_i32_1 = arith.constant 0 : i32
    return %c0_i32, %c0_i32_0 : i32, i32
  }
  func.func @transform_4(%arg0: i32) -> (i32, i32) {
    %c0_i32 = arith.constant 0 : i32
    %c0_i32_0 = arith.constant 0 : i32
    %c0_i32_1 = arith.constant 0 : i32
    return %c0_i32, %c0_i32_0 : i32, i32
  }
  func.func @transform_5(%arg0: i32) -> (i32, i32) {
    %c0_i32 = arith.constant 0 : i32
    %c0_i32_0 = arith.constant 0 : i32
    %c0_i32_1 = arith.constant 0 : i32
    return %c0_i32, %c0_i32_0 : i32, i32
  }
  func.func @transform_6(%arg0: i32) -> (i32, i32) {
    %c0_i32 = arith.constant 0 : i32
    %c0_i32_0 = arith.constant 0 : i32
    %c0_i32_1 = arith.constant 0 : i32
    return %c0_i32, %c0_i32_0 : i32, i32
  }
  func.func @transform_7(%arg0: i32) -> (i32, i32) {
    %c0_i32 = arith.constant 0 : i32
    %c0_i32_0 = arith.constant 0 : i32
    %c0_i32_1 = arith.constant 0 : i32
    return %c0_i32, %c0_i32_0 : i32, i32
  }
  func.func @transform_8(%arg0: i32) -> (i32, i32) {
    %c0_i32 = arith.constant 0 : i32
    %c0_i32_0 = arith.constant 0 : i32
    %c0_i32_1 = arith.constant 0 : i32
    return %c0_i32, %c0_i32_0 : i32, i32
  }
  func.func @transform_9(%arg0: i32) -> (i32, i32, i32, i32) {
    %c0_i32 = arith.constant 0 : i32
    %c0_i32_0 = arith.constant 0 : i32
    %c0_i32_1 = arith.constant 0 : i32
    %c0_i32_2 = arith.constant 0 : i32
    return %c0_i32, %arg0, %c0_i32_0, %c0_i32_1 : i32, i32, i32, i32
  }
  func.func @transform_10(%arg0: i32) -> (i32, i32, i32) {
    %c0_i32 = arith.constant 0 : i32
    %c0_i32_0 = arith.constant 0 : i32
    %c0_i32_1 = arith.constant 0 : i32
    %c0_i32_2 = arith.constant 0 : i32
    return %c0_i32, %c0_i32_0, %c0_i32_1 : i32, i32, i32
  }
}

</mosaic_0001>

<bundles_post_ra>
// kernel: tpu_custom_call.1
= control target key start
LH: loop header
LB: loop body
LE: loop exit
PB: predicated region body
PF: predicated region fallthrough
CT: control target
= control target key end

     0   :  { %s5012_s0 = inlined_call_operand.vmem [shape: f32[2,8,16,4], index: 0, kind: input, shape index: {}]   ;;  %s5013_s1 = inlined_call_operand.hbm [shape: bf16[2,16,16], index: 1, kind: input, shape index: {}]   ;;  %s5014_s2 = inlined_call_operand.hbm [shape: bf16[12,384], index: 2, kind: input, shape index: {}]   ;;  %s5015_s3 = inlined_call_operand.vmem [shape: bf16[4,384], index: 3, kind: input, shape index: {}]   ;;  %s5016_s4 = inlined_call_operand.hbm [shape: bf16[384,256], index: 4, kind: input, shape index: {}]   ;;  %s5017_s5 = inlined_call_operand.vmem [shape: bf16[128,256], index: 5, kind: input, shape index: {}]   ;;  %s5018_s6 = inlined_call_operand.vmem [shape: bf16[384,128], index: 6, kind: input, shape index: {}]   ;;  %s5019_s7 = inlined_call_operand.hbm [shape: bf16[128,128], index: 7, kind: input, shape index: {}]   ;;  %s5020_s8 = inlined_call_operand.vmem [shape: f32[1,384], index: 8, kind: input, shape index: {}]   ;;  %s5021_s9 = inlined_call_operand.hbm [shape: f32[2,8,16,32], index: 9, kind: output, shape index: {0}]   ;;  %s5022_s10 = inlined_call_operand.hbm [shape: f32[2,16,32], index: 10, kind: output, shape index: {1}]  }
   0x1   :  { %5084 = sst [smem:[#allocation89_spill]] %s5014_s2 }
   0x2   :  { %16 = vsyncpa [#allocation6], 0 }
   0x3   :  { %17 = vsyncpa [#allocation9], 0 }
   0x4   :  { %18 = vsyncpa [#allocation12], 0 }
   0x5   :  { %19 = vsyncpa [#allocation7], 0 }
   0x6   :  { %21 = vsyncpa [#allocation7 + $0x1], 0 }
   0x7   :  { %22 = vsyncpa [#allocation15], 0  ;;  %s3944_s13 = smov 0   ;;  %s3946_s14 = smov 0  }
   0x8   :  { %s3948_s15 = smov 0   ;;  %s3950_s16 = smov 0  }
   0x9 LB: > { %s3965_s17 = sadd.s32 4294967295, %s3861_s16   ;;  %s2902_s18 = sadd.s32 4294967294, %s3861_s16   ;;  %s3861_s16 = sphi %s3950_s16, %s5242_s16   ;;  %s3857_s15 = sphi %s3948_s15, %s5241_s15   ;;  %s3853_s14 = sphi %s3946_s14, %s5240_s14   ;;  %s3849_s13 = sphi %s3944_s13, %s5239_s13  }
   0xa   : > { %s3969_s19 = sadd.s32 1, %s3861_s16   ;;  %s35_s20 = sadd.s32 1, %s3857_s15 }
   0xb   : > { %s32_s21 = ssub.s32 %s3861_s16, %s3969_s19  ;;  %p42_p0 = scmp.ne.s32.totalorder %s3857_s15, %s3853_s14 }
   0xc   : > { %p33_p1 = scmp.eq.s32.totalorder %s32_s21, 0  ;;  %p43_p2 = scmp.eq.s32.totalorder %s3861_s16, 0 }
   0xd   : > { %p5023_p3 = scmp.eq.s32.totalorder %s3965_s17, 3  ;;  %p245_p4 = scmp.ne.s32.totalorder %s3853_s14, %s3849_s13 }
   0xe   : > { %s3981_s22 = scalar_select %p33_p1, %s3857_s15, %s35_s20  }
   0xf   : > { %p3983_p5 = por %p43_p2, %p42_p0  ;;  %p3989_p6 = por %p5023_p3, %p42_p0 }
  0x10   : > { %5085 = sst [smem:[#allocation23_spill]] %s3981_s22  ;;  %p246_p7 = scmp.eq.s32.totalorder %s2902_s18, 3 }
  0x11   : > { %s5087_s24 = scalar_select %p3989_p6, 1, 0 }
  0x12   : > { %p2903_p8 = scmp.ge.s32.totalorder %s3861_s16, 1  ;;  %p274_p9 = scmp.lt.s32.totalorder %s3861_s16, 5 }
  0x13   : > { %p3996_p11 = por %p246_p7, %p245_p4  ;;  %p5024_p12 = scmp.eq.s32.totalorder %s3965_s17, 0 }
  0x14   : > { %p4001_p13 = pnand %p2903_p8, %p274_p9  ;;  %s3863_s27 = smov [#allocation8]  }
  0x15   : > { %s5088_s25 = scalar_select %p3996_p11, 1, 0 }
  0x16   : > { %s299_s28 = sshll.u32 %s3863_s27, 4  ;;  %p3380_p0 = pneg %p4001_p13  ;;  %s300_s28 = int_to_ptr.vmem [resolvable:$true] %s299_s28 }
  0x17   : > { %s3864_s30 = smov [#allocation5]   ;;  %s3694_s12 = scalar_lea.vmem %s300_s28, 384 }
  0x18   : > { %p4009_p1 = pnand %p5024_p12, %p3380_p0  ;;  %s286_s11 = sshll.u32 %s3864_s30, 4  ;;  %s287_s11 = int_to_ptr.vmem [resolvable:$true] %s286_s11 }
  0x19   : > { %p3695_p4 = scmp.ne.s32.totalorder %s300_s28, %s3694_s12  ;;  %p3702_p9 = scmp.lt.s32.totalorder %s300_s28, %s300_s28 }
  0x1a   : > { %p3685_p2 = pneg %p4009_p1  ;;  %p3703_p3 = scmp.lt.s32.totalorder %s3694_s12, %s3694_s12 }
  0x1c   : > { %p3697_p7 = pnand %p3695_p4, %p3685_p2  ;;  %p3704_p10 = por %p3703_p3, %p3702_p9 }
  0x1e   : > { %p3698_p8 = pneg %p3697_p7 }
  0x20   : > { %p3705_p0 = pnand %p3704_p10, %p3698_p8 }
  0x22   : > { %3708 = shalt.err (!%p3705_p0)
}
  0x23   : > { %s3865_s18 = smov 192   ;;  %s3866_s20 = smov 12  }
  0x24   : > { %s5091_s2 = sld [smem:[#allocation89_spill]]  ;;  %s3720_s30 = scalar_lea.vmem %s287_s11, 256 }
  0x25   : > { %p3721_p12 = scmp.ne.s32.totalorder %s287_s11, %s3720_s30  ;;  %p3728_p11 = scmp.lt.s32.totalorder %s287_s11, %s287_s11 }
  0x26   : > { %p3729_p6 = scmp.lt.s32.totalorder %s3720_s30, %s3720_s30 }
  0x27   : > { %p3723_p4 = pnand %p3721_p12, %p3685_p2 }
  0x28   : > { %p3730_p3 = por %p3729_p6, %p3728_p11 }
  0x29   : > { %p3724_p7 = pneg %p3723_p4 }
  0x2a   : > { %3386 = dma.hbm_to_vmem [thread:$0]  (!%p4009_p1), %s5091_s2, 384, %s300_s28, [#allocation9], %s3865_s18, %s3865_s18, %s3866_s20  }
  0x2b   : > { %p3731_p10 = pnand %p3730_p3, %p3724_p7 }
  0x2d   : > { %3734 = shalt.err (!%p3731_p10)
}
  0x2e   : > { %s5026_s12 = smov 64   ;;  %s3868_s22 = smov 4  }
  0x2f   : > { %3383 = dma.hbm_to_vmem [thread:$0]  (!%p4009_p1), %s5013_s1, 256, %s287_s11, [#allocation6], %s5026_s12, %s5026_s12, %s3868_s22  }
  0x30   : > { %s3869_s20 = smov [#allocation10]  }
  0x31   : > { %s315_s21 = sshll.u32 %s3869_s20, 4  ;;  %s316_s21 = int_to_ptr.vmem [resolvable:$true] %s315_s21 }
  0x32   : > { %s3746_s27 = scalar_lea.vmem %s316_s21, 6144  ;;  %p3754_p8 = scmp.lt.s32.totalorder %s316_s21, %s316_s21 }
  0x33   : > { %p3747_p12 = scmp.ne.s32.totalorder %s316_s21, %s3746_s27  ;;  %p3755_p9 = scmp.lt.s32.totalorder %s3746_s27, %s3746_s27 }
  0x35   : > { %p3749_p6 = pnand %p3747_p12, %p3685_p2  ;;  %p3756_p0 = por %p3755_p9, %p3754_p8 }
  0x37   : > { %p3750_p11 = pneg %p3749_p6 }
  0x39   : > { %p3757_p4 = pnand %p3756_p0, %p3750_p11 }
  0x3b   : > { %3760 = shalt.err (!%p3757_p4)
}
  0x3c   : > { %s3870_s30 = smov 128   ;;  %s3871_s2 = smov 8  }
  0x3d   : > { %3389 = dma.hbm_to_vmem [thread:$0]  (!%p4009_p1), %s5016_s4, 6144, %s316_s21, [#allocation9], %s3870_s30, %s3870_s30, %s3871_s2  }
  0x3e   : > { %s3872_s18 = smov [#allocation11]  }
  0x3f   : > { %s334_s20 = sshll.u32 %s3872_s18, 4  ;;  %s335_s20 = int_to_ptr.vmem [resolvable:$true] %s334_s20 }
  0x40   : > { %s3772_s12 = scalar_lea.vmem %s335_s20, 1024  ;;  %p3780_p12 = scmp.lt.s32.totalorder %s335_s20, %s335_s20 }
  0x41   : > { %p3773_p7 = scmp.ne.s32.totalorder %s335_s20, %s3772_s12  ;;  %p3781_p6 = scmp.lt.s32.totalorder %s3772_s12, %s3772_s12 }
  0x43   : > { %p3775_p3 = pnand %p3773_p7, %p3685_p2  ;;  %p3782_p11 = por %p3781_p6, %p3780_p12 }
  0x45   : > { %p3776_p10 = pneg %p3775_p3 }
  0x47   : > { %p3783_p8 = pnand %p3782_p11, %p3776_p10 }
  0x49   : > { %3786 = shalt.err (!%p3783_p8)
}
  0x4a   : > { %s5092_s27 = smov 64   ;;  %p2908_p9 = scmp.ge.s32.totalorder %s3861_s16, 4 }
  0x4b   : > { %3392 = dma.hbm_to_vmem [thread:$0]  (!%p4009_p1), %s5019_s7, 1024, %s335_s20, [#allocation12], %s5092_s27, %s5092_s27, %s3868_s22  }
  0x4c   : > { %347 = sbr.rel (%p2908_p9) target bundleno = 89 (0x59), region = 48 }
  0x51   : > { %350 = sbr.rel (!%p3983_p5) target bundleno = 89 (0x59), region = 52  ;;  %s352_s12 = sand.u32 (%p3983_p5), 1, %s3857_s15  }
  0x52   : > { %s3073_s30 = sshll.u32 (%p3983_p5), %s3861_s16, 5  ;;  %s2909_s11 = sshll.u32 (%p3983_p5), %s352_s12, 6 }
  0x53   : > { %s358_s18 = scalar_lea.vmem (%p3983_p5), %s5012_s0, %s3073_s30  ;;  %s354_s2 = scalar_lea.vmem (%p3983_p5), [#allocation4], %s2909_s11 }
  0x54   : > { %v401_v0 = vld [vmem:[%s358_s18] sm:$0xff] (%p3983_p5)  ;;  %v403_v1 = vld [vmem:[%s358_s18 + $0x8] sm:$0xff] (%p3983_p5)  ;;  %v405_v2 = vld [vmem:[%s358_s18 + $0x10] sm:$0xff] (%p3983_p5) }
  0x55   : > { %402 = vst [vmem:[%s354_s2] sm:$0xff] (%p3983_p5), %v401_v0  ;;  %404 = vst [vmem:[%s354_s2 + $0x8] sm:$0xff] (%p3983_p5), %v403_v1  ;;  %v407_v3 = vld [vmem:[%s358_s18 + $0x18] sm:$0xff] (%p3983_p5)  ;;  %v409_v4 = vld [vmem:[%s358_s18 + $0x80] sm:$0xff] (%p3983_p5) }
  0x56   : > { %406 = vst [vmem:[%s354_s2 + $0x10] sm:$0xff] %v405_v2  ;;  %v411_v5 = vld [vmem:[%s358_s18 + $0x88] sm:$0xff]  ;;  %408 = vst [vmem:[%s354_s2 + $0x18] sm:$0xff] %v407_v3  ;;  %v413_v6 = vld [vmem:[%s358_s18 + $0x90] sm:$0xff] }
  0x57   : > { %410 = vst [vmem:[%s354_s2 + $0x20] sm:$0xff] %v409_v4  ;;  %412 = vst [vmem:[%s354_s2 + $0x28] sm:$0xff] %v411_v5  ;;  %v415_v7 = vld [vmem:[%s358_s18 + $0x98] sm:$0xff] }
  0x58   : > { %414 = vst [vmem:[%s354_s2 + $0x30] sm:$0xff] %v413_v6  ;;  %416 = vst [vmem:[%s354_s2 + $0x38] sm:$0xff] %v415_v7 }
  0x59 PF: > { %425 = sbr.rel (%p4001_p13) target bundleno = 2277 (0x8e5), region = 90 }
  0x5e   : > { %s428_s22 = sand.u32 1, %s3853_s14   ;;  %p5093_p5 = scmp.eq.s32.totalorder %s3965_s17, 0 }
  0x5f   : > { %s2914_s23 = sshll.u32 %s428_s22, 6 }
  0x60   : > { %s4066_s20 = scalar_lea.vmem [#allocation4], %s2914_s23 }
  0x61   : > { %3828 = dma.done.wait (%p5093_p5), [#allocation6], 256   ;;  %p5094_p1 = pmov %p5093_p5 }
  0x63   : > { %3830 = vsyncadd (%p5094_p1), [#allocation6], 4294967040  ;;  %p5095_p2 = pmov %p5094_p1 }
  0x64   : > { %p5096_p0 = pmov %p5094_p1 }
  0x65   : > { %3832 = dma.done.wait (%p5095_p2), [#allocation9], 6528  }
  0x66   : > { %3834 = vsyncadd (%p5096_p0), [#allocation9], 4294960768  ;;  %p5097_p13 = pmov %p5096_p0 }
  0x67   : > { %p5098_p4 = pmov %p5096_p0 }
  0x68   : > { %3836 = dma.done.wait (%p5097_p13), [#allocation12], 1024  }
  0x69   : > { %3838 = vsyncadd (%p5098_p4), [#allocation12], 4294966272  ;;  %s4080_s26 = scalar_lea.vmem [#allocation13], %s2914_s23  ;;  %p5099_p7 = scmp.ne.s32.totalorder %s3965_s17, 0 }
  0x6b   : > { %487 = sbr.rel (%p5099_p7) target bundleno = 115 (0x73), region = 114 }
  0x70   : > { %v3873_v8 = vmov 0.0  }
  0x71   : > { %488 = vst [vmem:[#allocation3 + $0x10] sm:$0xff] %v3873_v8  ;;  %489 = vst [vmem:[#allocation3] sm:$0xff] %v3873_v8 }
  0x72   : > { %490 = vst [vmem:[#allocation3 + $0x18] sm:$0xff] %v3873_v8  ;;  %491 = vst [vmem:[#allocation3 + $0x8] sm:$0xff] %v3873_v8 }
  0x73 PF: > { %v497_v9 = vld [vmem:[%s4066_s20] sm:$0xff]  ;;  %v498_v10 = vld [vmem:[%s4066_s20 + $0x8] sm:$0xff]  ;;  %v5029_v11 = vmov 0.0   ;;  %vm3875_vm0 = vmmov 0   ;;  %v499_v15 = vld [vmem:[%s4066_s20 + $0x10] sm:$0xff]  ;;  %vm514_vm1 = vcmask 130048   ;;  %v723_v36 = vlaneseq }
  0x74   : > { %3186 = vmatprep.subr.bf16.mxu0 %v5029_v11  ;;  %3192 = vmatprep.subr.bf16.mxu1 %v5029_v11  ;;  %v4088_v12 = vpack.c.bf16 %v498_v10, %v497_v9  ;;  %v4090_v13 = vld [vmem:[#allocation5] sm:$0xff]   ;;  %v4096_v14 = vld [vmem:[#allocation5 + $0x8] sm:$0xff]   ;;  %v500_v16 = vld [vmem:[%s4066_s20 + $0x18] sm:$0xff]  ;;  %vm756_vm2 = vcmask 1045504   ;;  %v5027_v21 = vmov 0   ;;  %s3877_s27 = smov 4  }
  0x75   : > { %3188 = vmatprep.mubr.msk.bf16.mxu0 %vm3875_vm0, %v5029_v11  ;;  %3194 = vmatprep.mubr.msk.bf16.mxu1 %vm3875_vm0, %v5029_v11  ;;  %v4104_v17 = vpack.c.bf16 %v500_v16, %v499_v15  ;;  %v3468_v18 = vld [vmem:[#allocation8 + $0x4] ss:$12 sps:$4 sm:$0x3f]   ;;  %v3470_v19 = vld [vmem:[#allocation8] ss:$12 sps:$4 sm:$0x3f]  }
  0x76   : > { %3187 = vmatpush3.bf16.msra.mxu0 %v4088_v12  ;;  %3193 = vmatpush3.bf16.msra.mxu1 %v4088_v12  ;;  %v758_v20 = vsel %vm756_vm2, %v3470_v19, 0  ;;  %v3471_v26 = vld [vmem:[#allocation8 + $0x8] ss:$12 sps:$4 sm:$0x3f]   ;;  %v3878_v37 = vmov 1983009808  }
  0x77   : > { %3198 = vmatprep.subr.bf16.mxu0 %v5029_v11  ;;  %3204 = vmatprep.subr.bf16.mxu1 %v5029_v11  ;;  %v4121_v29 = vsel %vm756_vm2, %v3471_v26, 0  ;;  %v884_v38 = vunpack.c.l.s4 %v3878_v37  ;;  %s3879_s21 = smov 8   ;;  %v4124_v41 = vshrl.u32 %v723_v36, 7  ;;  %v880_v49 = vld [vmem:[%s5015_s3] sm:$0x3f]  ;;  %v502_v56 = vld [vmem:[%s4066_s20 + $0x28] sm:$0xff] }
  0x78   : > { %v4133_v50 = vld [vmem:[%s5020_s8] sm:$0x7]  ;;  %v882_v54 = vcombine.high %v880_v49, %v880_v49  ;;  %vm904_vm3 = vcmask 1041408   ;;  %vm616_vm4 = vcmask 31744   ;;  %v503_v63 = vld [vmem:[%s4066_s20 + $0x30] sm:$0xff]  ;;  %v504_v0 = vld [vmem:[%s4066_s20 + $0x38] sm:$0xff] }
  0x79   : > { %3189 = vmatmul.mubr.msk.bf16.vlgmr.msra.gmra.mxu0 %vm514_vm1, %v4090_v13  ;;  %3195 = vmatmul.mubr.msk.bf16.vlgmr.msra.gmra.mxu1 %vm514_vm1, %v4096_v14  ;;  %v885_v42 = vunpack.c.0.s8 %v884_v38  ;;  %v725_v51 = vsub.s32 0, %v4124_v41  ;;  %v733_v52 = vsub.s32 2, %v4124_v41  ;;  %v501_v55 = vld [vmem:[%s4066_s20 + $0x20] sm:$0xff]  ;;  %v508_v1 = vpack.c.bf16 %v504_v0, %v503_v63  ;;  %v4157_v2 = vld [vmem:[#allocation3 + $0x10] sm:$0xff]  ;;  %s2732_s29 = scalar_lea.sflag [#allocation7], %s428_s22 }
  0x7a   : > { %3199 = vmatpush3.bf16.msra.mxu0 %v4104_v17  ;;  %3205 = vmatpush3.bf16.msra.mxu1 %v4104_v17  ;;  %v4147_v61 = vpack.c.bf16 %v502_v56, %v501_v55  ;;  %v4159_v3 = vld [vmem:[#allocation3] sm:$0xff]  ;;  %v4175_v7 = vld [vmem:[#allocation10 + $0x64] ss:$8 sps:$4 sm:$0xff]   ;;  %v4179_v8 = vld [vmem:[#allocation10 + $0x60] ss:$8 sps:$4 sm:$0xff]   ;;  %vm620_vm5 = vcmask 64512  }
  0x7b   : > { %3200 = vmatprep.mubr.msk.bf16.mxu0 %vm3875_vm0, %v5029_v11  ;;  %3206 = vmatprep.mubr.msk.bf16.mxu1 %vm3875_vm0, %v5029_v11  ;;  %v888_v46 = vsub.s32 %v885_v42, %v4124_v41  ;;  %v4142_v58 = vrot.slane %v4133_v50, %v725_v51  ;;  %v4145_v59 = vrot.slane %v4133_v50, %v733_v52  ;;  %v4171_v5 = vld [vmem:[#allocation10 + $0x70] ss:$8 sps:$4 sm:$0xff]   ;;  %v4173_v6 = vld [vmem:[#allocation10 + $0x74] ss:$8 sps:$4 sm:$0xff]   ;;  %v4188_v15 = vld [vmem:[#allocation10 + $0x44] ss:$8 sps:$4 sm:$0xff]  }
  0x7c   : > { %2930 = vmatprep.subr.msk.bf16.mxu1 %vm756_vm2, %v3468_v18  ;;  %v4164_v4 = vpack.c.bf16 %v4159_v3, %v4157_v2  ;;  %v4182_v9 = vld [vmem:[#allocation10 + $0x54] ss:$8 sps:$4 sm:$0xff]   ;;  %v4185_v10 = vld [vmem:[#allocation10 + $0x50] ss:$8 sps:$4 sm:$0xff]   ;;  %v4191_v16 = vld [vmem:[#allocation10 + $0x40] ss:$8 sps:$4 sm:$0xff]  }
  0x7d   : > { %v4137_v53 = vrot.slane %v880_v49, %v888_v46  ;;  %v896_v60 = vrot.slane %v882_v54, %v888_v46  ;;  %v4194_v18 = vld [vmem:[#allocation10 + $0x34] ss:$8 sps:$4 sm:$0xff]   ;;  %v4197_v19 = vld [vmem:[#allocation10 + $0x30] ss:$8 sps:$4 sm:$0xff]   ;;  %vm751_vm6 = vcmask 97280   ;;  %vm2192_vm7 = vcmask 261120  }
  0x7e   : > { %5100 = vst [vmem:[#allocation24_spill] sm:$0xff] %v4197_v19  ;;  %v4248_v36 = vld [vmem:[#allocation10 + $0xf0] ss:$8 sps:$4 sm:$0xff]   ;;  %v4252_v37 = vld [vmem:[#allocation10 + $0xe4] ss:$8 sps:$4 sm:$0xff]  }
  0x7f   : > { %3351 = vmatprep.subr.msk.bf16.mxu0 %vm904_vm3, %v896_v60  ;;  %v912_v62 = vsel %vm904_vm3, %v896_v60, 0  ;;  %5108 = vst [vmem:[#allocation32_spill] sm:$0xff] %v4248_v36  ;;  %5109 = vst [vmem:[#allocation33_spill] sm:$0xff] %v4252_v37  ;;  %v4254_v38 = vld [vmem:[#allocation10 + $0xe0] ss:$8 sps:$4 sm:$0xff]  }
  0x80   : > { %5110 = vst [vmem:[#allocation34_spill] sm:$0xff] %v4254_v38  ;;  %v4264_v42 = vld [vmem:[#allocation10 + $0xd4] ss:$8 sps:$4 sm:$0xff]   ;;  %v4276_v46 = vld [vmem:[#allocation10 + $0xc4] ss:$8 sps:$4 sm:$0xff]  }
  0x81   : > { %3201 = vmatmul.mubr.msk.bf16.vlgmr.msra.gmra.mxu0 %vm514_vm1, %v4090_v13  ;;  %3207 = vmatmul.mubr.msk.bf16.vlgmr.msra.gmra.mxu1 %vm514_vm1, %v4096_v14  ;;  %5111 = vst [vmem:[#allocation35_spill] sm:$0xff] %v4264_v42  ;;  %5113 = vst [vmem:[#allocation37_spill] sm:$0xff] %v4276_v46  ;;  %v4283_v49 = vld [vmem:[#allocation10 + $0x150] ss:$8 sps:$4 sm:$0xff]   ;;  %v4288_v51 = vld [vmem:[#allocation10 + $0xb4] ss:$8 sps:$4 sm:$0xff]  }
  0x82   : > { %781 = vmatpush1.bf16.msra.mxu1 %v758_v20  ;;  %798 = vmatprep.mubr.bf16.mxu1 %v5027_v21  ;;  %v4200_v20 = vld [vmem:[#allocation10 + $0x24] ss:$8 sps:$4 sm:$0xff]   ;;  %5115 = vst [vmem:[#allocation39_spill] sm:$0xff] %v4288_v51  ;;  %v4290_v52 = vld [vmem:[#allocation10 + $0xb0] ss:$8 sps:$4 sm:$0xff]  }
  0x83   : > { %3350 = vmatprep.subr.msk.bf16.mxu1 %vm756_vm2, %v3471_v26  ;;  %3218 = vmatprep.mubr.msk.bf16.mxu0 %vm616_vm4, %v4147_v61  ;;  %5101 = vst [vmem:[#allocation25_spill] sm:$0xff] %v4200_v20  ;;  %v897_v26 = vcombine.high %v4137_v53, %v4137_v53  ;;  %5116 = vst [vmem:[#allocation40_spill] sm:$0xff] %v4290_v52  ;;  %v4297_v55 = vld [vmem:[#allocation10 + $0x140] ss:$8 sps:$4 sm:$0xff]   ;;  %v4313_v63 = vld [vmem:[#allocation10 + $0x130] ss:$8 sps:$4 sm:$0xff]  }
  0x84   : > { %3217 = vmatpush3.bf16.msra.mxu0 %v912_v62  ;;  %v4306_v60 = vld [vmem:[#allocation10 + $0xa0] ss:$8 sps:$4 sm:$0xff]  }
  0x85   : > { %3222 = vmatprep.subr.bf16.mxu0 %v5029_v11  ;;  %5119 = vst [vmem:[#allocation43_spill] sm:$0xff] %v4306_v60 }
  0x89   : > { %3219 = vmatmul.mubr.msk.bf16.vlgmr.msra.gmra.mxu0 %vm616_vm4, %v508_v1 }
  0x8a   : > { %3224 = vmatprep.mubr.msk.bf16.mxu0 %vm3875_vm0, %v5029_v11  ;;  %3223 = vmatpush3.bf16.msra.mxu0 %v4164_v4 }
  0x8b   : > { %1498 = vmatprep.subr.bf16.mxu0 %v4173_v6 }
  0x91   : > { %3225 = vmatmul.mubr.msk.bf16.vlgmr.msra.gmra.mxu0 %vm514_vm1, %v4090_v13 }
  0x92   : > { %1499 = vmatpush1.bf16.msra.mxu0 %v4171_v5 }
  0x93   : > { %1500 = vmatprep.subr.bf16.mxu0 %v4175_v7 }
  0x96   : > { %1501 = vmatpush1.bf16.msra.mxu0 %v4179_v8 }
  0x97   : > { %1502 = vmatprep.subr.bf16.mxu0 %v4182_v9 }
  0x9a   : > { %1503 = vmatpush1.bf16.msra.mxu0 %v4185_v10 }
  0x9b   : > { %1504 = vmatprep.subr.bf16.mxu0 %v4188_v15 }
  0x9e   : > { %1505 = vmatpush1.bf16.msra.mxu0 %v4191_v16 }
  0x9f   : > { %1506 = vmatprep.subr.bf16.mxu0 %v4194_v18 }
  0xa2   : > { %1507 = vmatpush1.bf16.msra.mxu0 %v4197_v19 }
  0xa3   : > { %1508 = vmatprep.subr.bf16.mxu0 %v4200_v20 }
 0x139   : > { %v552_v22 = vpop.f32.mrf.mxu0  ;;  %v602_v23 = vpop.f32.mrf.mxu1 }
 0x13b   : > { %v3190_v24 = vpop.f32.mrf.mxu0  ;;  %v3196_v25 = vpop.f32.mrf.mxu1 }
 0x13d   : > { %v555_v27 = vpop.f32.mrf.mxu0  ;;  %v605_v28 = vpop.f32.mrf.mxu1 }
 0x13e   : > { %v559_v30 = vpack.c.bf16 %v555_v27, %v552_v22  ;;  %v609_v35 = vpack.c.bf16 %v605_v28, %v602_v23  ;;  %v4203_v22 = vld [vmem:[#allocation10 + $0x20] ss:$8 sps:$4 sm:$0xff]  }
 0x13f   : > { %v3191_v31 = vpop.f32.mrf.mxu0  ;;  %v3197_v32 = vpop.f32.mrf.mxu1  ;;  %5102 = vst [vmem:[#allocation26_spill] sm:$0xff] %v4203_v22  ;;  %1509 = vmatpush1.bf16.msra.mxu0 %v4203_v22 }
 0x140   : > { %611 = vrot.lane.b32.xlu0 %v559_v30, %s3877_s27 }
 0x141   : > { %v657_v33 = vpop.f32.mrf.mxu0  ;;  %v699_v34 = vpop.f32.mrf.mxu1 }
 0x143   : > { %v3202_v39 = vpop.f32.mrf.mxu0  ;;  %v3208_v40 = vpop.f32.mrf.mxu1 }
 0x144   : > { %614 = vrot.lane.b32.xlu0 %v609_v35, %s3879_s21  ;;  %v4246_v35 = vld [vmem:[#allocation10 + $0xf4] ss:$8 sps:$4 sm:$0xff]   ;;  %v4259_v40 = vld [vmem:[#allocation10 + $0x170] ss:$8 sps:$4 sm:$0xff]  }
 0x145   : > { %v660_v43 = vpop.f32.mrf.mxu0  ;;  %v702_v44 = vpop.f32.mrf.mxu1  ;;  %5107 = vst [vmem:[#allocation31_spill] sm:$0xff] %v4246_v35  ;;  %v4256_v39 = vld [vmem:[#allocation10 + $0x174] ss:$8 sps:$4 sm:$0xff]  }
 0x146   : > { %v664_v45 = vpack.c.bf16 %v660_v43, %v657_v33  ;;  %v706_v57 = vpack.c.bf16 %v702_v44, %v699_v34  ;;  %v4240_v33 = vld [vmem:[#allocation10 + $0x4] ss:$8 sps:$4 sm:$0xff]   ;;  %v4242_v34 = vld [vmem:[#allocation10] ss:$8 sps:$4 sm:$0xff]   ;;  %v4266_v43 = vld [vmem:[#allocation10 + $0xd0] ss:$8 sps:$4 sm:$0xff]  }
 0x147   : > { %v3203_v47 = vpop.f32.mrf.mxu0  ;;  %v3209_v48 = vpop.f32.mrf.mxu1  ;;  %5105 = vst [vmem:[#allocation29_spill] sm:$0xff] %v4240_v33  ;;  %5106 = vst [vmem:[#allocation30_spill] sm:$0xff] %v4242_v34  ;;  %v4268_v44 = vld [vmem:[#allocation10 + $0x164] ss:$8 sps:$4 sm:$0xff]  }
 0x148   : > { %708 = vrot.lane.b32.xlu1 %v664_v45, %s3877_s27  ;;  %5112 = vst [vmem:[#allocation36_spill] sm:$0xff] %v4266_v43  ;;  %v4271_v45 = vld [vmem:[#allocation10 + $0x160] ss:$8 sps:$4 sm:$0xff]   ;;  %v4280_v48 = vld [vmem:[#allocation10 + $0x154] ss:$8 sps:$4 sm:$0xff]  }
 0x149   : > { %v4278_v47 = vld [vmem:[#allocation10 + $0xc0] ss:$8 sps:$4 sm:$0xff]   ;;  %v4294_v54 = vpop.f32.mrf.mxu0 }
 0x14a   : > { %5114 = vst [vmem:[#allocation38_spill] sm:$0xff] %v4278_v47  ;;  %5117 = vst [vmem:[#allocation41_spill] sm:$0xff] %v4294_v54  ;;  %v4348_v54 = vld [vmem:[#allocation10 + $0x100] ss:$8 sps:$4 sm:$0xff]  }
 0x14b   : > { %v4301_v56 = vpop.f32.mrf.mxu0 }
 0x14c   : > { %711 = vrot.lane.b32.xlu1 %v706_v57, %s3879_s21  ;;  %v4304_v57 = vld [vmem:[#allocation10 + $0xa4] ss:$8 sps:$4 sm:$0xff]  }
 0x14d   : > { %5118 = vst [vmem:[#allocation42_spill] sm:$0xff] %v4304_v57  ;;  %v4310_v62 = vpop.f32.mrf.mxu0 }
 0x14e   : > { %5120 = vst [vmem:[#allocation44_spill] sm:$0xff] %v4310_v62  ;;  %v4345_v62 = vld [vmem:[#allocation10 + $0x104] ss:$8 sps:$4 sm:$0xff]  }
 0x14f   : > { %v4317_v0 = vpop.f32.mrf.mxu0 }
 0x1b2   : > { %v612_v23 = vpop.permute.xlu0 %611 }
 0x1b3   : > { %v619_v24 = vsel %vm616_vm4, %v4088_v12, %v612_v23  ;;  %v906_v12 = vsel %vm904_vm3, %v4137_v53, 0  ;;  %v4292_v53 = vld [vmem:[#allocation10 + $0x144] ss:$8 sps:$4 sm:$0xff]   ;;  %v4322_v23 = vld [vmem:[#allocation10 + $0x90] ss:$8 sps:$4 sm:$0xff]  }
 0x1b4   : > { %5122 = vst [vmem:[#allocation46_spill] sm:$0xff] %v4322_v23 }
 0x1b6   : > { %v615_v25 = vpop.permute.xlu0 %614 }
 0x1b7   : > { %v622_v27 = vsel %vm620_vm5, %v619_v24, %v615_v25  ;;  %v4324_v24 = vld [vmem:[#allocation10 + $0x124] ss:$8 sps:$4 sm:$0xff]   ;;  %v1208_v25 = vpop.f32.mrf.mxu0 }
 0x1b8   : > { %2931 = vmatmul.mubr.msk.bf16.vlgmr.msra.gmra.mxu1 %vm751_vm6, %v622_v27 }
 0x1b9   : > { %3211 = vmatpush3.bf16.msra.mxu1 %v4121_v29  ;;  %808 = vmatprep.mubr.bf16.mxu1 %v5027_v21  ;;  %v4236_v29 = vld [vmem:[#allocation10 + $0x10] ss:$8 sps:$4 sm:$0xff]  }
 0x1ba   : > { %v709_v28 = vpop.permute.xlu1 %708  ;;  %2935 = vmatprep.subr.msk.bf16.mxu1 %vm904_vm3, %v897_v26  ;;  %5104 = vst [vmem:[#allocation28_spill] sm:$0xff] %v4236_v29  ;;  %v4327_v26 = vld [vmem:[#allocation10 + $0x120] ss:$8 sps:$4 sm:$0xff]  }
 0x1bb   : > { %v715_v30 = vsel %vm616_vm4, %v4104_v17, %v709_v28  ;;  %v4234_v17 = vld [vmem:[#allocation10 + $0x14] ss:$8 sps:$4 sm:$0xff]   ;;  %v4332_v28 = vld [vmem:[#allocation10 + $0x84] ss:$8 sps:$4 sm:$0xff]  }
 0x1bc   : > { %5103 = vst [vmem:[#allocation27_spill] sm:$0xff] %v4234_v17  ;;  %1510 = vmatprep.subr.bf16.mxu0 %v4234_v17  ;;  %5123 = vst [vmem:[#allocation47_spill] sm:$0xff] %v4332_v28 }
 0x1bd   : > { %1511 = vmatpush1.bf16.msra.mxu0 %v4236_v29 }
 0x1be   : > { %v712_v31 = vpop.permute.xlu1 %711  ;;  %1512 = vmatprep.subr.bf16.mxu0 %v4240_v33 }
 0x1bf   : > { %v717_v32 = vsel %vm620_vm5, %v715_v30, %v712_v31  ;;  %v4334_v30 = vld [vmem:[#allocation10 + $0x80] ss:$8 sps:$4 sm:$0xff]   ;;  %v4336_v31 = vld [vmem:[#allocation10 + $0x114] ss:$8 sps:$4 sm:$0xff]  }
 0x1c0   : > { %2932 = vmatmul.mubr.msk.bf16.gmra.mxu1 %vm751_vm6, %v717_v32  ;;  %5124 = vst [vmem:[#allocation48_spill] sm:$0xff] %v4334_v30 }
 0x1c1   : > { %3212 = vmatprep.mubr.msk.bf16.mxu1 %vm751_vm6, %v622_v27  ;;  %1513 = vmatpush1.bf16.msra.mxu0 %v4242_v34  ;;  %v3226_v27 = vpop.f32.mrf.mxu0 }
 0x1c2   : > { %1514 = vmatprep.subr.bf16.mxu0 %v4246_v35  ;;  %v5125_v27 = vmov 0.0  }
 0x1c5   : > { %1515 = vmatpush2.bf16.msra.mxu0 %v4248_v36 }
 0x1c6   : > { %1516 = vmatprep.subr.bf16.mxu0 %v4252_v37 }
 0x1c8   : > { %3213 = vmatmul.mubr.msk.bf16.vlgmr.msra.gmra.mxu1 %vm751_vm6, %v717_v32  ;;  %v1211_v32 = vpop.f32.mrf.mxu0 }
 0x1c9   : > { %929 = vmatpush1.bf16.msra.mxu1 %v906_v12  ;;  %946 = vmatprep.mubr.bf16.mxu1 %v5027_v21  ;;  %v4339_v12 = vld [vmem:[#allocation10 + $0x110] ss:$8 sps:$4 sm:$0xff]  }
 0x1ca   : > { %3228 = vmatprep.subr.bf16.mxu1 %v5029_v11  ;;  %1517 = vmatpush2.bf16.msra.mxu0 %v4254_v38 }
 0x1cb   : > { %1518 = vmatprep.subr.bf16.mxu0 %v4264_v42 }
 0x1ce   : > { %1519 = vmatpush2.bf16.msra.mxu0 %v4266_v43 }
 0x1cf   : > { %1520 = vmatprep.subr.bf16.mxu0 %v4276_v46 }
 0x1d0   : > { %2936 = vmatmul.mubr.msk.bf16.vlgmr.msra.gmra.mxu1 %vm616_vm4, %v4147_v61  ;;  %v4308_v61 = vld [vmem:[#allocation10 + $0x134] ss:$8 sps:$4 sm:$0xff]  }
 0x1d1   : > { %3229 = vmatpush3.bf16.msra.mxu1 %v4164_v4  ;;  %956 = vmatprep.mubr.bf16.mxu1 %v5027_v21 }
 0x1d2   : > { %1541 = vmatprep.subr.bf16.mxu1 %v4256_v39  ;;  %1521 = vmatpush2.bf16.msra.mxu0 %v4278_v47 }
 0x1d3   : > { %1522 = vmatprep.subr.bf16.mxu0 %v4288_v51 }
 0x1d6   : > { %1523 = vmatpush2.bf16.msra.mxu0 %v4290_v52 }
 0x1d7   : > { %1524 = vmatprep.subr.bf16.mxu0 %v4304_v57 }
 0x1d8   : > { %2937 = vmatmul.mubr.msk.bf16.gmra.mxu1 %vm616_vm4, %v508_v1  ;;  %v4320_v1 = vld [vmem:[#allocation10 + $0x94] ss:$8 sps:$4 sm:$0xff]  }
 0x1d9   : > { %3230 = vmatprep.mubr.msk.bf16.mxu1 %vm3875_vm0, %v5029_v11  ;;  %5121 = vst [vmem:[#allocation45_spill] sm:$0xff] %v4320_v1  ;;  %v3227_v11 = vpop.f32.mrf.mxu0 }
 0x1da   : > { %1525 = vmatpush2.bf16.msra.mxu0 %v4306_v60  ;;  %v4357_v11 = vld [vmem:[%s5017_s5 + $0x74] ss:$8 sps:$4 sm:$0xff]  }
 0x1db   : > { %1526 = vmatprep.subr.bf16.mxu0 %v4320_v1 }
 0x1de   : > { %1527 = vmatpush2.bf16.msra.mxu0 %v4322_v23 }
 0x1df   : > { %1528 = vmatprep.subr.bf16.mxu0 %v4332_v28 }
 0x1e0   : > { %3231 = vmatmul.mubr.msk.bf16.vlgmr.msra.gmra.mxu1 %vm514_vm1, %v4096_v14 }
 0x1e1   : > { %1573 = vmatprep.mubr.bf16.mxu1 %v5027_v21  ;;  %1542 = vmatpush1.bf16.msra.mxu1 %v4259_v40  ;;  %v1215_v21 = vpack.c.bf16 %v1211_v32, %v1208_v25 }
 0x1e2   : > { %1543 = vmatprep.subr.bf16.mxu1 %v4268_v44  ;;  %1529 = vmatpush2.bf16.msra.mxu0 %v4334_v30 }
 0x1e3   : > { %3234 = vmatprep.subr.bf16.mxu0 %v5125_v27  ;;  %1530 = vmatprep.mubr.bf16.mxu0 %v1215_v21  ;;  %v729_v21 = vsub.s32 1, %v4124_v41 }
 0x1e5   : > { %1544 = vmatpush1.bf16.msra.mxu1 %v4271_v45  ;;  %1531 = vmatmul.mubr.bf16.vlgmr.msra.gmra.mxu0 %v4164_v4  ;;  %v730_v4 = vrot.slane %v4133_v50, %v729_v21 }
 0x1e6   : > { %1545 = vmatprep.subr.bf16.mxu1 %v4280_v48  ;;  %3236 = vmatprep.mubr.msk.bf16.mxu0 %vm3875_vm0, %v5125_v27 }
 0x1e9   : > { %1546 = vmatpush1.bf16.msra.mxu1 %v4283_v49 }
 0x1ea   : > { %1547 = vmatprep.subr.bf16.mxu1 %v4292_v53 }
 0x1ed   : > { %1548 = vmatpush1.bf16.msra.mxu1 %v4297_v55 }
 0x1ee   : > { %1549 = vmatprep.subr.bf16.mxu1 %v4308_v61 }
 0x1f1   : > { %1550 = vmatpush1.bf16.msra.mxu1 %v4313_v63 }
 0x1f2   : > { %1551 = vmatprep.subr.bf16.mxu1 %v4324_v24 }
 0x1f5   : > { %1552 = vmatpush1.bf16.msra.mxu1 %v4327_v26 }
 0x1f6   : > { %1553 = vmatprep.subr.bf16.mxu1 %v4336_v31 }
 0x1f9   : > { %1554 = vmatpush1.bf16.msra.mxu1 %v4339_v12 }
 0x1fa   : > { %1555 = vmatprep.subr.bf16.mxu1 %v4345_v62 }
 0x1fd   : > { %1556 = vmatpush1.bf16.msra.mxu1 %v4348_v54 }
 0x1fe   : > { %1664 = vmatprep.subr.bf16.mxu1 %v4357_v11 }
 0x278   : > { %v800_v25 = vpop.f32.mrf.mxu1 }
 0x279   : > { %v4363_v32 = vadd.f32 %v800_v25, %v4142_v58 }
 0x27a   : > { %v802_v30 = vpop.f32.mrf.mxu1 }
 0x27b   : > { %v4365_v28 = vadd.f32 %v802_v30, %v730_v4 }
 0x27c   : > { %v804_v23 = vpop.f32.mrf.mxu1 }
 0x27d   : > { %v4368_v1 = vadd.f32 %v804_v23, %v4142_v58 }
 0x27e   : > { %v806_v60 = vpop.f32.mrf.mxu1 }
 0x27f   : > { %v4370_v57 = vadd.f32 %v806_v60, %v730_v4 }
 0x280   : > { %v810_v52 = vpop.f32.mrf.mxu1 }
 0x281   : > { %v4373_v51 = vadd.f32 %v810_v52, %v4142_v58 }
 0x282   : > { %v812_v41 = vpop.f32.mrf.mxu1 }
 0x283   : > { %5126 = vst [vmem:[#allocation49_spill] sm:$0xff] %v4373_v51  ;;  %v4375_v50 = vadd.f32 %v812_v41, %v730_v4 }
 0x284   : > { %v814_v21 = vpop.f32.mrf.mxu1 }
 0x285   : > { %5127 = vst [vmem:[#allocation50_spill] sm:$0xff] %v4375_v50  ;;  %v4378_v25 = vadd.f32 %v814_v21, %v4142_v58 }
 0x286   : > { %v816_v30 = vpop.f32.mrf.mxu1 }
 0x287   : > { %5128 = vst [vmem:[#allocation51_spill] sm:$0xff] %v4378_v25  ;;  %v4380_v47 = vadd.f32 %v816_v30, %v730_v4 }
 0x288   : > { %v4382_v46 = vpop.f32.mrf.mxu1 }
 0x289   : > { %5129 = vst [vmem:[#allocation52_spill] sm:$0xff] %v4380_v47  ;;  %5130 = vst [vmem:[#allocation53_spill] sm:$0xff] %v4382_v46 }
 0x28a   : > { %v4384_v23 = vpop.f32.mrf.mxu1 }
 0x28c   : > { %v4386_v60 = vpop.f32.mrf.mxu1 }
 0x28d   : > { %5131 = vst [vmem:[#allocation54_spill] sm:$0xff] %v4386_v60 }
 0x28e   : > { %v4388_v43 = vpop.f32.mrf.mxu1 }
 0x290   : > { %v948_v52 = vpop.f32.mrf.mxu1 }
 0x291   : > { %v4391_v51 = vadd.f32 %v948_v52, %v4142_v58 }
 0x292   : > { %v950_v41 = vpop.f32.mrf.mxu1 }
 0x293   : > { %v4393_v50 = vadd.f32 %v950_v41, %v730_v4 }
 0x294   : > { %v952_v21 = vpop.f32.mrf.mxu1 }
 0x295   : > { %v4396_v25 = vadd.f32 %v952_v21, %v4142_v58 }
 0x296   : > { %v954_v30 = vpop.f32.mrf.mxu1 }
 0x297   : > { %v4398_v47 = vadd.f32 %v954_v30, %v730_v4  ;;  %v4413_v30 = vld [vmem:[%s5017_s5 + $0x70] ss:$8 sps:$4 sm:$0xff]  }
 0x298   : > { %v958_v46 = vpop.f32.mrf.mxu1  ;;  %5136 = vst [vmem:[#allocation59_spill] sm:$0xff] %v4413_v30 }
 0x299   : > { %v4401_v42 = vadd.f32 %v958_v46, %v4142_v58 }
 0x29a   : > { %v960_v60 = vpop.f32.mrf.mxu1 }
 0x29b   : > { %5132 = vst [vmem:[#allocation55_spill] sm:$0xff] %v4401_v42  ;;  %v4403_v38 = vadd.f32 %v960_v60, %v730_v4  ;;  %v4418_v60 = vld [vmem:[%s5017_s5 + $0x64] ss:$8 sps:$4 sm:$0xff]   ;;  %v4485_v42 = vld [vmem:[%s5017_s5 + $0x10] ss:$8 sps:$4 sm:$0xff]  }
 0x29c   : > { %v962_v37 = vpop.f32.mrf.mxu1  ;;  %5137 = vst [vmem:[#allocation60_spill] sm:$0xff] %v4418_v60  ;;  %5149 = vst [vmem:[#allocation71_spill] sm:$0xff] %v4485_v42 }
 0x29d   : > { %5133 = vst [vmem:[#allocation56_spill] sm:$0xff] %v4403_v38  ;;  %v4406_v52 = vadd.f32 %v962_v37, %v4142_v58  ;;  %v4424_v58 = vld [vmem:[%s5017_s5 + $0x60] ss:$8 sps:$4 sm:$0xff]   ;;  %v5139_v37 = vmov 0  }
 0x29e   : > { %v964_v41 = vpop.f32.mrf.mxu1  ;;  %5138 = vst [vmem:[#allocation61_spill] sm:$0xff] %v4424_v58 }
 0x29f   : > { %5134 = vst [vmem:[#allocation57_spill] sm:$0xff] %v4406_v52  ;;  %v4408_v36 = vadd.f32 %v964_v41, %v730_v4  ;;  %v4449_v4 = vld [vmem:[%s5017_s5 + $0x40] ss:$8 sps:$4 sm:$0xff]   ;;  %v4455_v41 = vld [vmem:[%s5017_s5 + $0x34] ss:$8 sps:$4 sm:$0xff]  }
 0x2a0   : > { %v1250_v35 = vpop.f32.mrf.mxu1  ;;  %5143 = vst [vmem:[#allocation65_spill] sm:$0xff] %v4449_v4  ;;  %5144 = vst [vmem:[#allocation66_spill] sm:$0xff] %v4455_v41  ;;  %v4479_v52 = vld [vmem:[%s5017_s5 + $0x14] ss:$8 sps:$4 sm:$0xff]  }
 0x2a1   : > { %5135 = vst [vmem:[#allocation58_spill] sm:$0xff] %v4408_v36  ;;  %v4473_v36 = vld [vmem:[%s5017_s5 + $0x20] ss:$8 sps:$4 sm:$0xff]   ;;  %5148 = vst [vmem:[#allocation70_spill] sm:$0xff] %v4479_v52 }
 0x2a2   : > { %v3232_v21 = vpop.f32.mrf.mxu1  ;;  %5147 = vst [vmem:[#allocation69_spill] sm:$0xff] %v4473_v36 }
 0x2a3   : > { %v4461_v21 = vld [vmem:[%s5017_s5 + $0x30] ss:$8 sps:$4 sm:$0xff]  }
 0x2a4   : > { %v1253_v34 = vpop.f32.mrf.mxu1  ;;  %5145 = vst [vmem:[#allocation67_spill] sm:$0xff] %v4461_v21 }
 0x2a5   : > { %v1257_v46 = vpack.c.bf16 %v1253_v34, %v1250_v35  ;;  %v4431_v34 = vld [vmem:[%s5017_s5 + $0x54] ss:$8 sps:$4 sm:$0xff]   ;;  %v4437_v35 = vld [vmem:[%s5017_s5 + $0x50] ss:$8 sps:$4 sm:$0xff]  }
 0x2a6   : > { %v3233_v38 = vpop.f32.mrf.mxu1  ;;  %5140 = vst [vmem:[#allocation62_spill] sm:$0xff] %v4431_v34  ;;  %5141 = vst [vmem:[#allocation63_spill] sm:$0xff] %v4437_v35 }
 0x2a7   : > { %1574 = vmatmul.mubr.bf16.vlgmr.msra.gmra.mxu1 %v1257_v46  ;;  %v4443_v38 = vld [vmem:[%s5017_s5 + $0x44] ss:$8 sps:$4 sm:$0xff]  }
 0x2a8   : > { %1665 = vmatpush1.bf16.msra.mxu1 %v4413_v30  ;;  %1696 = vmatprep.mubr.bf16.mxu1 %v5139_v37  ;;  %5142 = vst [vmem:[#allocation64_spill] sm:$0xff] %v4443_v38  ;;  %v4467_v46 = vld [vmem:[%s5017_s5 + $0x24] ss:$8 sps:$4 sm:$0xff]  }
 0x2a9   : > { %1666 = vmatprep.subr.bf16.mxu1 %v4418_v60  ;;  %5146 = vst [vmem:[#allocation68_spill] sm:$0xff] %v4467_v46 }
 0x2ac   : > { %1667 = vmatpush1.bf16.msra.mxu1 %v4424_v58 }
 0x2ad   : > { %1668 = vmatprep.subr.bf16.mxu1 %v4431_v34 }
 0x2b0   : > { %1669 = vmatpush1.bf16.msra.mxu1 %v4437_v35 }
 0x2b1   : > { %1670 = vmatprep.subr.bf16.mxu1 %v4443_v38 }
 0x2b4   : > { %1671 = vmatpush1.bf16.msra.mxu1 %v4449_v4 }
 0x2b5   : > { %1672 = vmatprep.subr.bf16.mxu1 %v4455_v41  ;;  %v4501_v41 = vld [vmem:[#allocation3 + $0x8] sm:$0xff] }
 0x2b8   : > { %1673 = vmatpush1.bf16.msra.mxu1 %v4461_v21  ;;  %v4491_v21 = vld [vmem:[%s5017_s5 + $0x4] ss:$8 sps:$4 sm:$0xff]  }
 0x2b9   : > { %1674 = vmatprep.subr.bf16.mxu1 %v4467_v46  ;;  %5150 = vst [vmem:[#allocation72_spill] sm:$0xff] %v4491_v21  ;;  %v4497_v46 = vld [vmem:[%s5017_s5] ss:$8 sps:$4 sm:$0xff]  }
 0x2ba   : > { %5151 = vst [vmem:[#allocation73_spill] sm:$0xff] %v4497_v46 }
 0x2bc   : > { %1675 = vmatpush1.bf16.msra.mxu1 %v4473_v36  ;;  %v4499_v36 = vld [vmem:[#allocation3 + $0x18] sm:$0xff] }
 0x2bd   : > { %1676 = vmatprep.subr.bf16.mxu1 %v4479_v52  ;;  %v1173_v52 = vpack.c.bf16 %v4501_v41, %v4499_v36 }
 0x2c0   : > { %1677 = vmatpush1.bf16.msra.mxu1 %v4485_v42  ;;  %v1532_v42 = vpop.f32.mrf.mxu0 }
 0x2c1   : > { %1678 = vmatprep.subr.bf16.mxu1 %v4491_v21 }
 0x2c2   : > { %v1534_v4 = vpop.f32.mrf.mxu0 }
 0x2c4   : > { %1679 = vmatpush1.bf16.msra.mxu1 %v4497_v46  ;;  %v1536_v34 = vpop.f32.mrf.mxu0 }
 0x2c5   : > { %3240 = vmatprep.subr.bf16.mxu1 %v5125_v27 }
 0x2c6   : > { %v1538_v29 = vpop.f32.mrf.mxu0 }
 0x2c7   : > { %1697 = vmatmul.mubr.bf16.vlgmr.msra.gmra.mxu1 %v1173_v52 }
 0x2c8   : > { %3242 = vmatprep.mubr.msk.bf16.mxu1 %vm3875_vm0, %v5125_v27 }
 0x367   : > { %v1575_v38 = vpop.f32.mrf.mxu1 }
 0x368   : > { %v1576_v35 = vadd.f32 %v1575_v38, %v1532_v42 }
 0x369   : > { %v1577_v58 = vpop.f32.mrf.mxu1 }
 0x36a   : > { %v4511_v60 = vadd.f32 %v1576_v35, %v4363_v32  ;;  %v1578_v21 = vadd.f32 %v1577_v58, %v1534_v4 }
 0x36b   : > { %v1579_v30 = vpop.f32.mrf.mxu1 }
 0x36c   : > { %v1708_v33 = vadd.f32 %v1578_v21, %v4365_v28  ;;  %v1580_v46 = vadd.f32 %v1579_v30, %v1536_v34 }
 0x36d   : > { %v1581_v17 = vpop.f32.mrf.mxu1 }
 0x36e   : > { %v3010_v52 = vmul.f32 -1.442695, %v1708_v33  ;;  %v4515_v22 = vadd.f32 %v1580_v46, %v4368_v1  ;;  %v1582_v20 = vadd.f32 %v1581_v17, %v1538_v29 }
 0x370   : > { %3601 = vpow2.f32 %v3010_v52  ;;  %v1710_v42 = vadd.f32 %v1582_v20, %v4370_v57 }
 0x372   : > { %v3011_v38 = vmul.f32 -1.442695, %v1710_v42  ;;  %v4552_v42 = vld [vmem:[%s5018_s6 + $0x70] sm:$0xff]  }
 0x374   : > { %3603 = vpow2.f32 %v3011_v38  ;;  %v4563_v38 = vld [vmem:[%s5018_s6 + $0x30] sm:$0xff]  }
 0x37d   : > { %v3602_v19 = vpop.eup %3601 }
 0x37e   : > { %v1751_v32 = vadd.f32 1.0, %v3602_v19 }
 0x380   : > { %3605 = vrcp.f32 %v1751_v32  ;;  %v4568_v32 = vld [vmem:[%s5018_s6 + $0xb0] sm:$0xff]  }
 0x381   : > { %v3604_v35 = vpop.eup %3603  ;;  %5153 = vst [vmem:[#allocation75_spill] sm:$0xff] %v4568_v32 }
 0x382   : > { %v1752_v58 = vadd.f32 1.0, %v3604_v35 }
 0x384   : > { %3607 = vrcp.f32 %v1752_v58  ;;  %v4584_v58 = vld [vmem:[%s5018_s6 + $0x28] sm:$0xff]  }
 0x387   : > { %v1698_v28 = vpop.f32.mrf.mxu1 }
 0x388   : > { %v4519_v30 = vadd.f32 %v1698_v28, %v4391_v51  ;;  %v4589_v28 = vld [vmem:[%s5018_s6 + $0xa8] sm:$0xff]  }
 0x389   : > { %v1700_v33 = vpop.f32.mrf.mxu1  ;;  %5154 = vst [vmem:[#allocation76_spill] sm:$0xff] %v4589_v28 }
 0x38a   : > { %v1712_v1 = vadd.f32 %v1700_v33, %v4393_v50  ;;  %v4531_v50 = vld [vmem:[%s5018_s6 + $0x78] sm:$0xff]  }
 0x38b   : > { %v1702_v34 = vpop.f32.mrf.mxu1 }
 0x38c   : > { %v3012_v17 = vmul.f32 -1.442695, %v1712_v1  ;;  %v4523_v29 = vadd.f32 %v1702_v34, %v4396_v25  ;;  %v4545_v25 = vld [vmem:[%s5018_s6 + $0xb8] sm:$0xff]   ;;  %v4596_v1 = vld [vmem:[%s5018_s6 + $0x60] sm:$0xff]  }
 0x38d   : > { %v1704_v20 = vpop.f32.mrf.mxu1  ;;  %v3606_v57 = vpop.eup %3605  ;;  %5152 = vst [vmem:[#allocation74_spill] sm:$0xff] %v4545_v25 }
 0x38e   : > { %3609 = vpow2.f32 %v3012_v17  ;;  %v1714_v19 = vadd.f32 %v1704_v20, %v4398_v47  ;;  %v1763_v46 = vmul.f32 %v3606_v57, %v4157_v2  ;;  %v4540_v47 = vld [vmem:[%s5018_s6 + $0x38] sm:$0xff]   ;;  %v4603_v17 = vld [vmem:[%s5018_s6 + $0x20] sm:$0xff]  }
 0x38f   : > { %v4608_v20 = vld [vmem:[%s5018_s6 + $0xa0] sm:$0xff]   ;;  %v4622_v57 = vld [vmem:[%s5018_s6 + $0x18] sm:$0xff]  }
 0x390   : > { %v3013_v4 = vmul.f32 -1.442695, %v1714_v19  ;;  %5155 = vst [vmem:[#allocation77_spill] sm:$0xff] %v4608_v20  ;;  %v4615_v19 = vld [vmem:[%s5018_s6 + $0x58] sm:$0xff]   ;;  %5157 = vst [vmem:[#allocation79_spill] sm:$0xff] %v4622_v57 }
 0x391   : > { %v3608_v21 = vpop.eup %3607  ;;  %5156 = vst [vmem:[#allocation78_spill] sm:$0xff] %v4615_v19 }
 0x392   : > { %3611 = vpow2.f32 %v3013_v4  ;;  %v1764_v51 = vmul.f32 %v3608_v21, %v4159_v3  ;;  %v4627_v4 = vld [vmem:[%s5018_s6 + $0x98] sm:$0xff]   ;;  %v4634_v21 = vld [vmem:[%s5018_s6 + $0x50] sm:$0xff]  }
 0x393   : > { %5158 = vst [vmem:[#allocation80_spill] sm:$0xff] %v4627_v4  ;;  %5159 = vst [vmem:[#allocation81_spill] sm:$0xff] %v4634_v21 }
 0x394   : > { %v4533_v52 = vpack.c.bf16 %v1764_v51, %v1763_v46  ;;  %v4641_v46 = vld [vmem:[%s5018_s6 + $0x10] sm:$0xff]  }
 0x395   : > { %5160 = vst [vmem:[#allocation82_spill] sm:$0xff] %v4641_v46  ;;  %v4646_v51 = vld [vmem:[%s5018_s6 + $0x90] sm:$0xff]  }
 0x396   : > { %3235 = vmatpush3.bf16.msra.mxu0 %v4533_v52  ;;  %3241 = vmatpush3.bf16.msra.mxu1 %v4533_v52  ;;  %5161 = vst [vmem:[#allocation83_spill] sm:$0xff] %v4646_v51 }
 0x397   : > { %3098 = vmatprep.subr.bf16.mxu0 %v4531_v50  ;;  %3246 = vmatprep.subr.bf16.mxu1 %v5125_v27 }
 0x399   : > { %3237 = vmatmul.mubr.msk.bf16.vlgmr.msra.gmra.mxu0 %vm514_vm1, %v4090_v13  ;;  %3243 = vmatmul.mubr.msk.bf16.vlgmr.msra.gmra.mxu1 %vm514_vm1, %v4096_v14  ;;  %v4575_v13 = vld [vmem:[%s5018_s6 + $0x68] sm:$0xff]  }
 0x39a   : > { %3099 = vmatpush3.bf16.msra.mxu0 %v4540_v47  ;;  %3247 = vmatpush3.bf16.msra.mxu1 %v4545_v25 }
 0x39b   : > { %v3610_v35 = vpop.eup %3609  ;;  %3100 = vmatprep.subr.bf16.mxu0 %v4552_v42  ;;  %3248 = vmatprep.subr.bf16.mxu1 %v5125_v27 }
 0x39c   : > { %v1753_v14 = vadd.f32 1.0, %v3610_v35  ;;  %3262 = vmatprep.mubr.msk.bf16.mxu1 %vm3875_vm0, %v5125_v27  ;;  %v4653_v35 = vld [vmem:[%s5018_s6 + $0x48] sm:$0xff]  }
 0x39d   : > { %5162 = vst [vmem:[#allocation84_spill] sm:$0xff] %v4653_v35 }
 0x39e   : > { %3101 = vmatpush3.bf16.msra.mxu0 %v4563_v38  ;;  %3249 = vmatpush3.bf16.msra.mxu1 %v4568_v32  ;;  %3613 = vrcp.f32 %v1753_v14  ;;  %v4669_v32 = vld [vmem:[%s5018_s6 + $0x88] sm:$0xff]  }
 0x39f   : > { %v3612_v33 = vpop.eup %3611  ;;  %3102 = vmatprep.subr.bf16.mxu0 %v4575_v13  ;;  %3250 = vmatprep.subr.bf16.mxu1 %v5125_v27  ;;  %5164 = vst [vmem:[#allocation86_spill] sm:$0xff] %v4669_v32 }
 0x3a0   : > { %v1754_v34 = vadd.f32 1.0, %v3612_v33 }
 0x3a2   : > { %3615 = vrcp.f32 %v1754_v34  ;;  %3103 = vmatpush3.bf16.msra.mxu0 %v4584_v58  ;;  %3251 = vmatpush3.bf16.msra.mxu1 %v4589_v28  ;;  %v4664_v28 = vld [vmem:[%s5018_s6 + $0x8] sm:$0xff]  }
 0x3a3   : > { %3104 = vmatprep.subr.bf16.mxu0 %v4596_v1  ;;  %3252 = vmatprep.subr.bf16.mxu1 %v5125_v27  ;;  %5163 = vst [vmem:[#allocation85_spill] sm:$0xff] %v4664_v28 }
 0x3a6   : > { %3105 = vmatpush3.bf16.msra.mxu0 %v4603_v17  ;;  %3253 = vmatpush3.bf16.msra.mxu1 %v4608_v20 }
 0x3a7   : > { %3106 = vmatprep.subr.bf16.mxu0 %v4615_v19  ;;  %3254 = vmatprep.subr.bf16.mxu1 %v5125_v27 }
 0x3aa   : > { %3107 = vmatpush3.bf16.msra.mxu0 %v4622_v57  ;;  %3255 = vmatpush3.bf16.msra.mxu1 %v4627_v4  ;;  %v4694_v57 = vld [vmem:[#allocation11 + $0x38] sm:$0xff]  }
 0x3ab   : > { %3108 = vmatprep.subr.bf16.mxu0 %v4634_v21  ;;  %3256 = vmatprep.subr.bf16.mxu1 %v5125_v27  ;;  %v3614_v14 = vpop.eup %3613 }
 0x3ac   : > { %v1765_v34 = vmul.f32 %v3614_v14, %v4499_v36  ;;  %v4676_v14 = vld [vmem:[%s5018_s6 + $0x40] sm:$0xff]  }
 0x3ad   : > { %5165 = vst [vmem:[#allocation87_spill] sm:$0xff] %v4676_v14 }
 0x3ae   : > { %3109 = vmatpush3.bf16.msra.mxu0 %v4641_v46  ;;  %3257 = vmatpush3.bf16.msra.mxu1 %v4646_v51 }
 0x3af   : > { %v3616_v33 = vpop.eup %3615  ;;  %3110 = vmatprep.subr.bf16.mxu0 %v4653_v35  ;;  %3258 = vmatprep.subr.bf16.mxu1 %v5125_v27 }
 0x3b0   : > { %v1766_v4 = vmul.f32 %v3616_v33, %v4501_v41  ;;  %v4687_v33 = vld [vmem:[%s5018_s6 + $0x80] sm:$0xff]  }
 0x3b1   : > { %5166 = vst [vmem:[#allocation88_spill] sm:$0xff] %v4687_v33 }
 0x3b2   : > { %v1768_v20 = vpack.c.bf16 %v1766_v4, %v1765_v34  ;;  %3111 = vmatpush3.bf16.msra.mxu0 %v4664_v28  ;;  %3259 = vmatpush3.bf16.msra.mxu1 %v4669_v32  ;;  %v4682_v4 = vld [vmem:[%s5018_s6] sm:$0xff]  }
 0x3b3   : > { %3260 = vmatprep.subr.bf16.mxu1 %v5125_v27  ;;  %3112 = vmatprep.subr.bf16.mxu0 %v4676_v14 }
 0x3b6   : > { %3113 = vmatpush3.bf16.msra.mxu0 %v4682_v4  ;;  %3261 = vmatpush3.bf16.msra.mxu1 %v4687_v33  ;;  %v4700_v33 = vld [vmem:[#allocation11 + $0x30] sm:$0xff]  }
 0x3b7   : > { %3266 = vmatprep.subr.bf16.mxu0 %v5125_v27  ;;  %3286 = vmatprep.subr.bf16.mxu1 %v5125_v27 }
 0x459   : > { %v1803_v34 = vpop.f32.mrf.mxu0  ;;  %v1845_v32 = vpop.f32.mrf.mxu1 }
 0x45b   : > { %v3238_v51 = vpop.f32.mrf.mxu0  ;;  %v3244_v25 = vpop.f32.mrf.mxu1 }
 0x45c   : > { %v4706_v25 = vld [vmem:[#allocation11 + $0x28] sm:$0xff]  }
 0x45d   : > { %v1806_v28 = vpop.f32.mrf.mxu0  ;;  %v1848_v35 = vpop.f32.mrf.mxu1 }
 0x45e   : > { %v1810_v46 = vpack.c.bf16 %v1806_v28, %v1803_v34  ;;  %v1852_v21 = vpack.c.bf16 %v1848_v35, %v1845_v32  ;;  %v4714_v32 = vld [vmem:[#allocation11 + $0x18] sm:$0xff]   ;;  %v4718_v28 = vld [vmem:[#allocation11 + $0x10] sm:$0xff]   ;;  %v3009_v35 = vmul.f32 -1.442695, %v4523_v29 }
 0x45f   : > { %v3239_v19 = vpop.f32.mrf.mxu0  ;;  %v3245_v14 = vpop.f32.mrf.mxu1 }
 0x460   : > { %2029 = vmatprep.mubr.bf16.mxu0 %v1810_v46  ;;  %3263 = vmatmul.mubr.bf16.vlgmr.msra.gmra.mxu1 %v1852_v21  ;;  %v4722_v19 = vld [vmem:[#allocation11 + $0x8] sm:$0xff]   ;;  %v4726_v21 = vld [vmem:[#allocation11] sm:$0xff]   ;;  %v857_v46 = vadd.f32 %v4388_v43, %v4145_v59 }
 0x461   : > { %2030 = vmatmul.mubr.bf16.vlgmr.msra.gmra.mxu0 %v4533_v52  ;;  %3288 = vmatprep.mubr.msk.bf16.mxu1 %vm3875_vm0, %v5125_v27  ;;  %v4710_v52 = vld [vmem:[#allocation11 + $0x20] sm:$0xff]  }
 0x462   : > { %3267 = vmatpush3.bf16.msra.mxu0 %v4694_v57  ;;  %3282 = vmatprep.mubr.msk.bf16.mxu0 %vm3875_vm0, %v5125_v27 }
 0x463   : > { %3268 = vmatprep.subr.bf16.mxu0 %v5125_v27 }
 0x466   : > { %3269 = vmatpush3.bf16.msra.mxu0 %v4700_v33 }
 0x467   : > { %3270 = vmatprep.subr.bf16.mxu0 %v5125_v27 }
 0x46a   : > { %3271 = vmatpush3.bf16.msra.mxu0 %v4706_v25 }
 0x46b   : > { %3272 = vmatprep.subr.bf16.mxu0 %v5125_v27 }
 0x46e   : > { %3273 = vmatpush3.bf16.msra.mxu0 %v4710_v52 }
 0x46f   : > { %3274 = vmatprep.subr.bf16.mxu0 %v5125_v27 }
 0x472   : > { %3275 = vmatpush3.bf16.msra.mxu0 %v4714_v32 }
 0x473   : > { %3276 = vmatprep.subr.bf16.mxu0 %v5125_v27 }
 0x476   : > { %3277 = vmatpush3.bf16.msra.mxu0 %v4718_v28 }
 0x477   : > { %3278 = vmatprep.subr.bf16.mxu0 %v5125_v27 }
 0x47a   : > { %3279 = vmatpush3.bf16.msra.mxu0 %v4722_v19 }
 0x47b   : > { %3280 = vmatprep.subr.bf16.mxu0 %v5125_v27 }
 0x47e   : > { %3281 = vmatpush3.bf16.msra.mxu0 %v4726_v21 }
 0x47f   : > { %2339 = vmatprep.subr.bf16.mxu0 %v4256_v39  ;;  %v3006_v39 = vmul.f32 -1.442695, %v4511_v60 }
 0x481   : > { %3283 = vmatmul.mubr.bf16.vlgmr.msra.gmra.mxu0 %v1768_v20  ;;  %3617 = vpow2.f32 %v3006_v39 }
 0x482   : > { %2340 = vmatpush1.bf16.msra.mxu0 %v4259_v40  ;;  %2371 = vmatprep.mubr.bf16.mxu0 %v5139_v37  ;;  %v3007_v40 = vmul.f32 -1.442695, %v4515_v22 }
 0x483   : > { %2341 = vmatprep.subr.bf16.mxu0 %v4268_v44 }
 0x484   : > { %3619 = vpow2.f32 %v3007_v40 }
 0x486   : > { %2342 = vmatpush1.bf16.msra.mxu0 %v4271_v45 }
 0x487   : > { %2343 = vmatprep.subr.bf16.mxu0 %v4280_v48 }
 0x48a   : > { %2344 = vmatpush1.bf16.msra.mxu0 %v4283_v49 }
 0x48b   : > { %2345 = vmatprep.subr.bf16.mxu0 %v4292_v53 }
 0x48e   : > { %2346 = vmatpush1.bf16.msra.mxu0 %v4297_v55  ;;  %v3618_v44 = vpop.eup %3617 }
 0x48f   : > { %2347 = vmatprep.subr.bf16.mxu0 %v4308_v61  ;;  %v1727_v53 = vadd.f32 1.0, %v3618_v44 }
 0x491   : > { %v3620_v49 = vpop.eup %3619  ;;  %3621 = vrcp.f32 %v1727_v53 }
 0x492   : > { %2348 = vmatpush1.bf16.msra.mxu0 %v4313_v63 }
 0x493   : > { %2349 = vmatprep.subr.bf16.mxu0 %v4324_v24 }
 0x496   : > { %2350 = vmatpush1.bf16.msra.mxu0 %v4327_v26 }
 0x497   : > { %2351 = vmatprep.subr.bf16.mxu0 %v4336_v31 }
 0x49a   : > { %2352 = vmatpush1.bf16.msra.mxu0 %v4339_v12 }
 0x49b   : > { %2353 = vmatprep.subr.bf16.mxu0 %v4345_v62  ;;  %v1728_v62 = vadd.f32 1.0, %v3620_v49 }
 0x49d   : > { %3623 = vrcp.f32 %v1728_v62 }
 0x49e   : > { %2354 = vmatpush1.bf16.msra.mxu0 %v4348_v54  ;;  %v854_v54 = vadd.f32 %v4384_v23, %v4145_v59  ;;  %v3622_v23 = vpop.eup %3621 }
 0x49f   : > { %2382 = vmatprep.subr.bf16.mxu0 %v4357_v11  ;;  %v3008_v11 = vmul.f32 -1.442695, %v4519_v30  ;;  %v2180_v39 = vsub.f32 1.0, %v3622_v23  ;;  %v2176_v30 = vmul.f32 %v3622_v23, %v4157_v2  ;;  %v1002_v2 = vadd.f32 %v4301_v56, %v4145_v59 }
 0x4aa   : > { %v3624_v34 = vpop.eup %3623 }
 0x4ab   : > { %v2181_v43 = vsub.f32 1.0, %v3624_v34 }
 0x520   : > { %v2072_v45 = vpop.f32.mrf.mxu1 }
 0x521   : > { %v3114_v48 = vpop.f32.mrf.mxu0 }
 0x522   : > { %v3264_v55 = vpop.f32.mrf.mxu1 }
 0x523   : > { %v3115_v61 = vpop.f32.mrf.mxu0  ;;  %v2177_v55 = vmul.f32 %v3624_v34, %v4159_v3 }
 0x524   : > { %v3116_v63 = vadd.f32 %v3115_v61, %v3114_v48  ;;  %v2075_v24 = vpop.f32.mrf.mxu1 }
 0x525   : > { %v3117_v26 = vpop.f32.mrf.mxu0 }
 0x526   : > { %v2073_v31 = vadd.f32 %v3116_v63, %v2072_v45  ;;  %v3265_v12 = vpop.f32.mrf.mxu1 }
 0x527   : > { %v3118_v22 = vpop.f32.mrf.mxu0  ;;  %v4778_v12 = vld [vmem:[#allocation5] sm:$0xff]  }
 0x528   : > { %v2168_v60 = vadd.f32 %v2073_v31, %v854_v54  ;;  %v3119_v20 = vadd.f32 %v3118_v22, %v3117_v26  ;;  %v1005_v31 = vadd.f32 %v4317_v0, %v4145_v59 }
 0x52a   : > { %3625 = vtanh.f32 %v2168_v60  ;;  %v2076_v51 = vadd.f32 %v3119_v20, %v2075_v24  ;;  %v4786_v20 = vld [vmem:[#allocation5 + $0x8] sm:$0xff]  }
 0x52b   : > { %3627 = vpow2.f32 %v3008_v11 }
 0x52c   : > { %v2169_v14 = vadd.f32 %v2076_v51, %v857_v46 }
 0x52e   : > { %3629 = vtanh.f32 %v2169_v14 }
 0x52f   : > { %3631 = vpow2.f32 %v3009_v35 }
 0x537   : > { %v3626_v40 = vpop.eup %3625 }
 0x538   : > { %v2184_v44 = vmul.f32 %v3626_v40, %v2180_v39  ;;  %v3628_v45 = vpop.eup %3627  ;;  %v5173_v40 = vld [vmem:[#allocation30_spill] sm:$0xff] }
 0x539   : > { %v1729_v53 = vadd.f32 1.0, %v3628_v45  ;;  %v5178_v45 = vld [vmem:[#allocation35_spill] sm:$0xff] }
 0x53a   : > { %v4757_v48 = vadd.f32 %v2184_v44, %v2176_v30  ;;  %v5175_v30 = vld [vmem:[#allocation32_spill] sm:$0xff]  ;;  %v5176_v44 = vld [vmem:[#allocation33_spill] sm:$0xff] }
 0x53b   : > { %v3630_v49 = vpop.eup %3629  ;;  %3633 = vrcp.f32 %v1729_v53  ;;  %v5182_v53 = vld [vmem:[#allocation39_spill] sm:$0xff] }
 0x53c   : > { %v3632_v29 = vpop.eup %3631  ;;  %v2185_v61 = vmul.f32 %v3630_v49, %v2181_v43  ;;  %2193 = vst.msk [vmem:[%s4080_s26] sm:$0xff] %vm2192_vm7, %v4757_v48  ;;  %v5179_v43 = vld [vmem:[#allocation36_spill] sm:$0xff]  ;;  %v5180_v49 = vld [vmem:[#allocation37_spill] sm:$0xff] }
 0x53d   : > { %v1730_v24 = vadd.f32 1.0, %v3632_v29  ;;  %v5181_v29 = vld [vmem:[#allocation38_spill] sm:$0xff] }
 0x53e   : > { %v4763_v63 = vadd.f32 %v2185_v61, %v2177_v55  ;;  %v5183_v55 = vld [vmem:[#allocation40_spill] sm:$0xff]  ;;  %v5184_v61 = vld [vmem:[#allocation42_spill] sm:$0xff] }
 0x53f   : > { %3635 = vrcp.f32 %v1730_v24  ;;  %v5185_v24 = vld [vmem:[#allocation43_spill] sm:$0xff] }
 0x540   : > { %2194 = vst.msk [vmem:[%s4080_s26 + $0x8] sm:$0xff] %vm2192_vm7, %v4763_v63  ;;  %v4772_v62 = vpack.c.bf16 %v4763_v63, %v4757_v48 }
 0x541   : > { %v2161_v26 = vpop.f32.mrf.mxu0 }
 0x542   : > { %v2170_v3 = vadd.f32 %v2161_v26, %v1002_v2  ;;  %3287 = vmatpush3.bf16.msra.mxu1 %v4772_v62  ;;  %v5186_v2 = vld [vmem:[#allocation45_spill] sm:$0xff]  ;;  %v5187_v26 = vld [vmem:[#allocation46_spill] sm:$0xff] }
 0x543   : > { %v3284_v54 = vpop.f32.mrf.mxu0  ;;  %3292 = vmatprep.subr.bf16.mxu1 %v5125_v27 }
 0x544   : > { %3637 = vtanh.f32 %v2170_v3  ;;  %v5188_v3 = vld [vmem:[#allocation47_spill] sm:$0xff]  ;;  %v5189_v54 = vld [vmem:[#allocation48_spill] sm:$0xff] }
 0x545   : > { %v2164_v56 = vpop.f32.mrf.mxu0  ;;  %3289 = vmatmul.mubr.msk.bf16.vlgmr.msra.gmra.mxu1 %vm514_vm1, %v4778_v12 }
 0x546   : > { %v2171_v22 = vadd.f32 %v2164_v56, %v1005_v31  ;;  %3293 = vmatpush3.bf16.msra.mxu1 %v4772_v62  ;;  %3294 = vmatprep.mubr.msk.bf16.mxu1 %vm3875_vm0, %v5125_v27 }
 0x547   : > { %v3285_v11 = vpop.f32.mrf.mxu0  ;;  %2296 = vmatprep.subr.bf16.mxu1 %v4173_v6 }
 0x548   : > { %3639 = vtanh.f32 %v2171_v22  ;;  %v3634_v60 = vpop.eup %3633 }
 0x549   : > { %v2182_v46 = vsub.f32 1.0, %v3634_v60  ;;  %v2178_v6 = vmul.f32 %v3634_v60, %v4499_v36  ;;  %v5170_v36 = vld [vmem:[#allocation27_spill] sm:$0xff] }
 0x54c   : > { %v3636_v0 = vpop.eup %3635 }
 0x54d   : > { %3295 = vmatmul.mubr.msk.bf16.vlgmr.msra.gmra.mxu1 %vm514_vm1, %v4786_v20  ;;  %v2183_v14 = vsub.f32 1.0, %v3636_v0 }
 0x54e   : > { %2297 = vmatpush1.bf16.msra.mxu1 %v4171_v5  ;;  %v2179_v5 = vmul.f32 %v3636_v0, %v4501_v41  ;;  %v5171_v41 = vld [vmem:[#allocation28_spill] sm:$0xff] }
 0x54f   : > { %2298 = vmatprep.subr.bf16.mxu1 %v4175_v7 }
 0x551   : > { %v3638_v51 = vpop.eup %3637 }
 0x552   : > { %v2186_v35 = vmul.f32 %v3638_v51, %v2182_v46  ;;  %2299 = vmatpush1.bf16.msra.mxu1 %v4179_v8  ;;  %v5167_v8 = vld [vmem:[#allocation24_spill] sm:$0xff] }
 0x553   : > { %2300 = vmatprep.subr.bf16.mxu1 %v4182_v9  ;;  %v5168_v9 = vld [vmem:[#allocation25_spill] sm:$0xff] }
 0x554   : > { %v4795_v23 = vadd.f32 %v2186_v35, %v2178_v6 }
 0x555   : > { %v3640_v34 = vpop.eup %3639 }
 0x556   : > { %v2187_v39 = vmul.f32 %v3640_v34, %v2183_v14  ;;  %2301 = vmatpush1.bf16.msra.mxu1 %v4185_v10  ;;  %2195 = vst.msk [vmem:[%s4080_s26 + $0x20] sm:$0xff] %vm2192_vm7, %v4795_v23  ;;  %v5169_v10 = vld [vmem:[#allocation26_spill] sm:$0xff]  ;;  %v5190_v14 = vld [vmem:[#allocation59_spill] sm:$0xff]  ;;  %v5191_v34 = vld [vmem:[#allocation60_spill] sm:$0xff] }
 0x557   : > { %2302 = vmatprep.subr.bf16.mxu1 %v4188_v15  ;;  %v5172_v15 = vld [vmem:[#allocation29_spill] sm:$0xff] }
 0x558   : > { %v4803_v7 = vadd.f32 %v2187_v39, %v2179_v5  ;;  %v5192_v39 = vld [vmem:[#allocation61_spill] sm:$0xff]  ;;  %v5193_v5 = vld [vmem:[#allocation62_spill] sm:$0xff] }
 0x55a   : > { %2303 = vmatpush1.bf16.msra.mxu1 %v4191_v16  ;;  %2196 = vst.msk [vmem:[%s4080_s26 + $0x28] sm:$0xff] %vm2192_vm7, %v4803_v7  ;;  %v5174_v16 = vld [vmem:[#allocation31_spill] sm:$0xff] }
 0x55b   : > { %2304 = vmatprep.subr.bf16.mxu1 %v4194_v18  ;;  %v5177_v18 = vld [vmem:[#allocation34_spill] sm:$0xff] }
 0x55e   : > { %2305 = vmatpush1.bf16.msra.mxu1 %v5167_v8  ;;  %v5194_v8 = vld [vmem:[#allocation63_spill] sm:$0xff] }
 0x55f   : > { %2306 = vmatprep.subr.bf16.mxu1 %v5168_v9  ;;  %v5196_v9 = vld [vmem:[#allocation65_spill] sm:$0xff] }
 0x562   : > { %2307 = vmatpush1.bf16.msra.mxu1 %v5169_v10  ;;  %v5197_v10 = vld [vmem:[#allocation66_spill] sm:$0xff] }
 0x563   : > { %2308 = vmatprep.subr.bf16.mxu1 %v5170_v36  ;;  %v5198_v36 = vld [vmem:[#allocation67_spill] sm:$0xff] }
 0x566   : > { %2309 = vmatpush1.bf16.msra.mxu1 %v5171_v41  ;;  %v5199_v41 = vld [vmem:[#allocation68_spill] sm:$0xff] }
 0x567   : > { %2310 = vmatprep.subr.bf16.mxu1 %v5172_v15  ;;  %v5200_v15 = vld [vmem:[#allocation69_spill] sm:$0xff] }
 0x56a   : > { %2311 = vmatpush1.bf16.msra.mxu1 %v5173_v40  ;;  %v5202_v40 = vld [vmem:[#allocation71_spill] sm:$0xff] }
 0x56b   : > { %2312 = vmatprep.subr.bf16.mxu1 %v5174_v16  ;;  %v5203_v16 = vld [vmem:[#allocation72_spill] sm:$0xff] }
 0x56e   : > { %2313 = vmatpush2.bf16.msra.mxu1 %v5175_v30  ;;  %v5204_v30 = vld [vmem:[#allocation73_spill] sm:$0xff] }
 0x56f   : > { %2314 = vmatprep.subr.bf16.mxu1 %v5176_v44  ;;  %v2211_v44 = vpack.c.bf16 %v4803_v7, %v4795_v23 }
 0x572   : > { %2315 = vmatpush2.bf16.msra.mxu1 %v5177_v18  ;;  %v5205_v18 = vld [vmem:[#allocation78_spill] sm:$0xff] }
 0x573   : > { %2316 = vmatprep.subr.bf16.mxu1 %v5178_v45  ;;  %v5206_v45 = vld [vmem:[#allocation79_spill] sm:$0xff] }
 0x576   : > { %2317 = vmatpush2.bf16.msra.mxu1 %v5179_v43  ;;  %v5208_v43 = vld [vmem:[#allocation82_spill] sm:$0xff] }
 0x577   : > { %2318 = vmatprep.subr.bf16.mxu1 %v5180_v49 }
 0x57a   : > { %2319 = vmatpush2.bf16.msra.mxu1 %v5181_v29 }
 0x57b   : > { %2320 = vmatprep.subr.bf16.mxu1 %v5182_v53  ;;  %v5212_v53 = vld [vmem:[#allocation49_spill] sm:$0xff] }
 0x57e   : > { %2321 = vmatpush2.bf16.msra.mxu1 %v5183_v55 }
 0x57f   : > { %2322 = vmatprep.subr.bf16.mxu1 %v5184_v61 }
 0x582   : > { %2323 = vmatpush2.bf16.msra.mxu1 %v5185_v24 }
 0x583   : > { %2324 = vmatprep.subr.bf16.mxu1 %v5186_v2  ;;  %v5213_v2 = vld [vmem:[#allocation50_spill] sm:$0xff] }
 0x586   : > { %2325 = vmatpush2.bf16.msra.mxu1 %v5187_v26 }
 0x587   : > { %2326 = vmatprep.subr.bf16.mxu1 %v5188_v3 }
 0x58a   : > { %2327 = vmatpush2.bf16.msra.mxu1 %v5189_v54 }
 0x58b   : > { %3298 = vmatprep.subr.bf16.mxu1 %v5125_v27 }
 0x605   : > { %v2246_v31 = vpop.f32.mrf.mxu1 }
 0x607   : > { %v3290_v56 = vpop.f32.mrf.mxu1 }
 0x609   : > { %v2249_v22 = vpop.f32.mrf.mxu1 }
 0x60a   : > { %v2253_v11 = vpack.c.bf16 %v2249_v22, %v2246_v31 }
 0x60b   : > { %v3291_v60 = vpop.f32.mrf.mxu1 }
 0x60c   : > { %2328 = vmatprep.mubr.bf16.mxu1 %v2253_v11  ;;  %v5215_v60 = vld [vmem:[#allocation52_spill] sm:$0xff] }
 0x60d   : > { %v2288_v0 = vpop.f32.mrf.mxu1  ;;  %2329 = vmatmul.mubr.bf16.vlgmr.msra.gmra.mxu1 %v4772_v62  ;;  %v5195_v62 = vld [vmem:[#allocation64_spill] sm:$0xff] }
 0x60e   : > { %3300 = vmatprep.mubr.msk.bf16.mxu1 %vm3875_vm0, %v5125_v27 }
 0x60f   : > { %v3296_v46 = vpop.f32.mrf.mxu1 }
 0x611   : > { %v2291_v51 = vpop.f32.mrf.mxu1 }
 0x612   : > { %v2295_v35 = vpack.c.bf16 %v2291_v51, %v2288_v0 }
 0x613   : > { %v3297_v6 = vpop.f32.mrf.mxu1 }
 0x614   : > { %2372 = vmatmul.mubr.bf16.vlgmr.msra.gmra.mxu0 %v2295_v35 }
 0x615   : > { %2383 = vmatpush1.bf16.msra.mxu0 %v5190_v14  ;;  %2414 = vmatprep.mubr.bf16.mxu0 %v5139_v37  ;;  %v5201_v37 = vld [vmem:[#allocation70_spill] sm:$0xff] }
 0x616   : > { %2384 = vmatprep.subr.bf16.mxu0 %v5191_v34 }
 0x619   : > { %2385 = vmatpush1.bf16.msra.mxu0 %v5192_v39  ;;  %v5216_v39 = vld [vmem:[#allocation55_spill] sm:$0xff] }
 0x61a   : > { %2386 = vmatprep.subr.bf16.mxu0 %v5193_v5 }
 0x61d   : > { %2387 = vmatpush1.bf16.msra.mxu0 %v5194_v8 }
 0x61e   : > { %2388 = vmatprep.subr.bf16.mxu0 %v5195_v62  ;;  %v5217_v62 = vld [vmem:[#allocation56_spill] sm:$0xff] }
 0x621   : > { %2389 = vmatpush1.bf16.msra.mxu0 %v5196_v9 }
 0x622   : > { %2390 = vmatprep.subr.bf16.mxu0 %v5197_v10 }
 0x625   : > { %2391 = vmatpush1.bf16.msra.mxu0 %v5198_v36 }
 0x626   : > { %2392 = vmatprep.subr.bf16.mxu0 %v5199_v41  ;;  %v5218_v41 = vld [vmem:[#allocation57_spill] sm:$0xff] }
 0x629   : > { %2393 = vmatpush1.bf16.msra.mxu0 %v5200_v15 }
 0x62a   : > { %2394 = vmatprep.subr.bf16.mxu0 %v5201_v37 }
 0x62d   : > { %2395 = vmatpush1.bf16.msra.mxu0 %v5202_v40  ;;  %v5219_v40 = vld [vmem:[#allocation58_spill] sm:$0xff] }
 0x62e   : > { %2396 = vmatprep.subr.bf16.mxu0 %v5203_v16 }
 0x631   : > { %2397 = vmatpush1.bf16.msra.mxu0 %v5204_v30 }
 0x632   : > { %3146 = vmatprep.subr.bf16.mxu0 %v4531_v50  ;;  %v5207_v50 = vld [vmem:[#allocation81_spill] sm:$0xff] }
 0x634   : > { %2415 = vmatmul.mubr.bf16.vlgmr.msra.gmra.mxu0 %v2211_v44 }
 0x635   : > { %3147 = vmatpush3.bf16.msra.mxu0 %v4540_v47  ;;  %v5209_v47 = vld [vmem:[#allocation84_spill] sm:$0xff] }
 0x636   : > { %3148 = vmatprep.subr.bf16.mxu0 %v4552_v42  ;;  %v5210_v42 = vld [vmem:[#allocation85_spill] sm:$0xff] }
 0x639   : > { %3149 = vmatpush3.bf16.msra.mxu0 %v4563_v38  ;;  %v5211_v38 = vld [vmem:[#allocation87_spill] sm:$0xff] }
 0x63a   : > { %3150 = vmatprep.subr.bf16.mxu0 %v4575_v13 }
 0x63d   : > { %3151 = vmatpush3.bf16.msra.mxu0 %v4584_v58 }
 0x63e   : > { %3152 = vmatprep.subr.bf16.mxu0 %v4596_v1 }
 0x641   : > { %3153 = vmatpush3.bf16.msra.mxu0 %v4603_v17 }
 0x642   : > { %3154 = vmatprep.subr.bf16.mxu0 %v5205_v18 }
 0x645   : > { %3155 = vmatpush3.bf16.msra.mxu0 %v5206_v45 }
 0x646   : > { %3156 = vmatprep.subr.bf16.mxu0 %v5207_v50 }
 0x649   : > { %3157 = vmatpush3.bf16.msra.mxu0 %v5208_v43 }
 0x64a   : > { %3158 = vmatprep.subr.bf16.mxu0 %v5209_v47 }
 0x64d   : > { %3159 = vmatpush3.bf16.msra.mxu0 %v5210_v42 }
 0x64e   : > { %3160 = vmatprep.subr.bf16.mxu0 %v5211_v38 }
 0x651   : > { %3161 = vmatpush3.bf16.msra.mxu0 %v4682_v4  ;;  %v5214_v4 = vld [vmem:[#allocation51_spill] sm:$0xff] }
 0x652   : > { %3330 = vmatprep.subr.bf16.mxu0 %v5125_v27 }
 0x6cd   : > { %v2330_v13 = vpop.f32.mrf.mxu1 }
 0x6cf   : > { %v2332_v58 = vpop.f32.mrf.mxu1 }
 0x6d1   : > { %v2334_v49 = vpop.f32.mrf.mxu1 }
 0x6d3   : > { %v2336_v54 = vpop.f32.mrf.mxu1 }
 0x6d4   : > { %v2373_v1 = vpop.f32.mrf.mxu0 }
 0x6d5   : > { %v2374_v17 = vadd.f32 %v2373_v1, %v2330_v13  ;;  %v5222_v1 = vld [vmem:[#allocation76_spill] sm:$0xff] }
 0x6d6   : > { %v2375_v29 = vpop.f32.mrf.mxu0 }
 0x6d7   : > { %v4873_v55 = vadd.f32 %v2374_v17, %v5212_v53  ;;  %v2376_v61 = vadd.f32 %v2375_v29, %v2332_v58  ;;  %v5220_v58 = vld [vmem:[#allocation74_spill] sm:$0xff] }
 0x6d8   : > { %v2377_v24 = vpop.f32.mrf.mxu0 }
 0x6d9   : > { %v2426_v26 = vadd.f32 %v2376_v61, %v5213_v2  ;;  %v2378_v3 = vadd.f32 %v2377_v24, %v2334_v49  ;;  %v5223_v49 = vld [vmem:[#allocation77_spill] sm:$0xff]  ;;  %v5224_v61 = vld [vmem:[#allocation80_spill] sm:$0xff]  ;;  %v5225_v2 = vld [vmem:[#allocation83_spill] sm:$0xff] }
 0x6da   : > { %v2379_v31 = vpop.f32.mrf.mxu0 }
 0x6db   : > { %v3054_v56 = vmul.f32 -1.442695, %v2426_v26  ;;  %v4877_v22 = vadd.f32 %v2378_v3, %v5214_v4  ;;  %v2380_v11 = vadd.f32 %v2379_v31, %v2336_v54  ;;  %v5226_v26 = vld [vmem:[#allocation86_spill] sm:$0xff]  ;;  %v5227_v3 = vld [vmem:[#allocation88_spill] sm:$0xff] }
 0x6dd   : > { %3641 = vpow2.f32 %v3054_v56  ;;  %v2428_v0 = vadd.f32 %v2380_v11, %v5215_v60 }
 0x6df   : > { %v3055_v46 = vmul.f32 -1.442695, %v2428_v0 }
 0x6e1   : > { %3643 = vpow2.f32 %v3055_v46 }
 0x6ea   : > { %v3642_v51 = vpop.eup %3641 }
 0x6eb   : > { %v2469_v35 = vadd.f32 1.0, %v3642_v51 }
 0x6ed   : > { %3645 = vrcp.f32 %v2469_v35 }
 0x6ee   : > { %v3644_v6 = vpop.eup %3643 }
 0x6ef   : > { %v2470_v14 = vadd.f32 1.0, %v3644_v6 }
 0x6f1   : > { %3647 = vrcp.f32 %v2470_v14 }
 0x6f4   : > { %v2416_v34 = vpop.f32.mrf.mxu0 }
 0x6f5   : > { %v4881_v5 = vadd.f32 %v2416_v34, %v5216_v39 }
 0x6f6   : > { %v2418_v8 = vpop.f32.mrf.mxu0 }
 0x6f7   : > { %v2430_v9 = vadd.f32 %v2418_v8, %v5217_v62 }
 0x6f8   : > { %v2420_v10 = vpop.f32.mrf.mxu0 }
 0x6f9   : > { %v3056_v36 = vmul.f32 -1.442695, %v2430_v9  ;;  %v4885_v15 = vadd.f32 %v2420_v10, %v5218_v41 }
 0x6fa   : > { %v2422_v37 = vpop.f32.mrf.mxu0  ;;  %v3646_v30 = vpop.eup %3645 }
 0x6fb   : > { %3649 = vpow2.f32 %v3056_v36  ;;  %v2432_v16 = vadd.f32 %v2422_v37, %v5219_v40  ;;  %v2481_v45 = vmul.f32 %v3646_v30, %v4757_v48  ;;  %v3053_v9 = vmul.f32 -1.442695, %v4885_v15  ;;  %v5229_v37 = vld [vmem:[#allocation54_spill] sm:$0xff] }
 0x6fc   : > { %v865_v40 = vadd.f32 %v5229_v37, %v4145_v59 }
 0x6fd   : > { %v3057_v44 = vmul.f32 -1.442695, %v2432_v16 }
 0x6fe   : > { %v3648_v18 = vpop.eup %3647 }
 0x6ff   : > { %3651 = vpow2.f32 %v3057_v44  ;;  %v2482_v50 = vmul.f32 %v3648_v18, %v4763_v63 }
 0x701   : > { %v2485_v43 = vpack.c.bf16 %v2482_v50, %v2481_v45 }
 0x703   : > { %3299 = vmatpush3.bf16.msra.mxu1 %v2485_v43 }
 0x704   : > { %3304 = vmatprep.subr.bf16.mxu1 %v5125_v27 }
 0x706   : > { %3301 = vmatmul.mubr.msk.bf16.vlgmr.msra.gmra.mxu1 %vm514_vm1, %v4778_v12  ;;  %v5221_v12 = vld [vmem:[#allocation75_spill] sm:$0xff] }
 0x707   : > { %3305 = vmatpush3.bf16.msra.mxu1 %v2485_v43  ;;  %3306 = vmatprep.mubr.msk.bf16.mxu1 %vm3875_vm0, %v5125_v27 }
 0x708   : > { %v3650_v47 = vpop.eup %3649  ;;  %3310 = vmatprep.subr.bf16.mxu1 %v5125_v27 }
 0x709   : > { %v2471_v42 = vadd.f32 1.0, %v3650_v47 }
 0x70b   : > { %3653 = vrcp.f32 %v2471_v42 }
 0x70c   : > { %v3652_v38 = vpop.eup %3651 }
 0x70d   : > { %v2472_v13 = vadd.f32 1.0, %v3652_v38 }
 0x70e   : > { %3307 = vmatmul.mubr.msk.bf16.vlgmr.msra.gmra.mxu1 %vm514_vm1, %v4786_v20 }
 0x70f   : > { %3655 = vrcp.f32 %v2472_v13  ;;  %3311 = vmatpush3.bf16.msra.mxu1 %v5220_v58  ;;  %3326 = vmatprep.mubr.msk.bf16.mxu1 %vm3875_vm0, %v5125_v27 }
 0x710   : > { %3312 = vmatprep.subr.bf16.mxu1 %v5125_v27 }
 0x713   : > { %3313 = vmatpush3.bf16.msra.mxu1 %v5221_v12 }
 0x714   : > { %3314 = vmatprep.subr.bf16.mxu1 %v5125_v27 }
 0x717   : > { %3315 = vmatpush3.bf16.msra.mxu1 %v5222_v1 }
 0x718   : > { %3316 = vmatprep.subr.bf16.mxu1 %v5125_v27  ;;  %v3654_v17 = vpop.eup %3653 }
 0x719   : > { %v2483_v29 = vmul.f32 %v3654_v17, %v4795_v23 }
 0x71b   : > { %3317 = vmatpush3.bf16.msra.mxu1 %v5223_v49 }
 0x71c   : > { %v3656_v20 = vpop.eup %3655  ;;  %3318 = vmatprep.subr.bf16.mxu1 %v5125_v27 }
 0x71d   : > { %v2484_v53 = vmul.f32 %v3656_v20, %v4803_v7  ;;  %v5230_v20 = vld [vmem:[#allocation41_spill] sm:$0xff] }
 0x71f   : > { %3319 = vmatpush3.bf16.msra.mxu1 %v5224_v61  ;;  %v2486_v24 = vpack.c.bf16 %v2484_v53, %v2483_v29  ;;  %v1010_v29 = vadd.f32 %v5230_v20, %v4145_v59 }
 0x720   : > { %3320 = vmatprep.subr.bf16.mxu1 %v5125_v27 }
 0x723   : > { %3321 = vmatpush3.bf16.msra.mxu1 %v5225_v2  ;;  %v5231_v2 = vld [vmem:[#allocation44_spill] sm:$0xff] }
 0x724   : > { %3322 = vmatprep.subr.bf16.mxu1 %v5125_v27 }
 0x727   : > { %3323 = vmatpush3.bf16.msra.mxu1 %v5226_v26  ;;  %v1013_v26 = vadd.f32 %v5231_v2, %v4145_v59 }
 0x728   : > { %3324 = vmatprep.subr.bf16.mxu1 %v5125_v27 }
 0x72b   : > { %3325 = vmatpush3.bf16.msra.mxu1 %v5227_v3 }
 0x7c6   : > { %v2521_v54 = vpop.f32.mrf.mxu1 }
 0x7c8   : > { %v3302_v31 = vpop.f32.mrf.mxu1 }
 0x7ca   : > { %v2524_v56 = vpop.f32.mrf.mxu1 }
 0x7cb   : > { %v2528_v4 = vpack.c.bf16 %v2524_v56, %v2521_v54 }
 0x7cc   : > { %v3303_v11 = vpop.f32.mrf.mxu1 }
 0x7cd   : > { %2603 = vmatprep.mubr.bf16.mxu0 %v2528_v4 }
 0x7ce   : > { %v2563_v60 = vpop.f32.mrf.mxu1  ;;  %2604 = vmatmul.mubr.bf16.vlgmr.msra.gmra.mxu0 %v2485_v43 }
 0x7cf   : > { %3331 = vmatpush3.bf16.msra.mxu0 %v4694_v57  ;;  %3346 = vmatprep.mubr.msk.bf16.mxu0 %vm3875_vm0, %v5125_v27  ;;  %v3050_v57 = vmul.f32 -1.442695, %v4873_v55 }
 0x7d0   : > { %v3308_v0 = vpop.f32.mrf.mxu1  ;;  %3332 = vmatprep.subr.bf16.mxu0 %v5125_v27 }
 0x7d1   : > { %3657 = vpow2.f32 %v3050_v57 }
 0x7d2   : > { %v2566_v46 = vpop.f32.mrf.mxu1 }
 0x7d3   : > { %v2570_v51 = vpack.c.bf16 %v2566_v46, %v2563_v60  ;;  %3333 = vmatpush3.bf16.msra.mxu0 %v4700_v33  ;;  %v3051_v33 = vmul.f32 -1.442695, %v4877_v22 }
 0x7d4   : > { %3334 = vmatprep.subr.bf16.mxu0 %v5125_v27  ;;  %v3309_v35 = vpop.f32.mrf.mxu1 }
 0x7d5   : > { %3327 = vmatmul.mubr.bf16.vlgmr.msra.gmra.mxu1 %v2570_v51  ;;  %3659 = vpow2.f32 %v3051_v33 }
 0x7d7   : > { %3335 = vmatpush3.bf16.msra.mxu0 %v4706_v25 }
 0x7d8   : > { %3336 = vmatprep.subr.bf16.mxu0 %v5125_v27 }
 0x7db   : > { %3337 = vmatpush3.bf16.msra.mxu0 %v4710_v52 }
 0x7dc   : > { %3338 = vmatprep.subr.bf16.mxu0 %v5125_v27 }
 0x7de   : > { %v3658_v52 = vpop.eup %3657 }
 0x7df   : > { %3339 = vmatpush3.bf16.msra.mxu0 %v4714_v32 }
 0x7e0   : > { %3340 = vmatprep.subr.bf16.mxu0 %v5125_v27 }
 0x7e2   : > { %v3660_v6 = vpop.eup %3659 }
 0x7e3   : > { %3341 = vmatpush3.bf16.msra.mxu0 %v4718_v28  ;;  %v2445_v28 = vadd.f32 1.0, %v3658_v52  ;;  %v2446_v34 = vadd.f32 1.0, %v3660_v6 }
 0x7e4   : > { %3342 = vmatprep.subr.bf16.mxu0 %v5125_v27 }
 0x7e5   : > { %3661 = vrcp.f32 %v2445_v28 }
 0x7e6   : > { %3663 = vrcp.f32 %v2446_v34 }
 0x7e7   : > { %3343 = vmatpush3.bf16.msra.mxu0 %v4722_v19  ;;  %v3052_v19 = vmul.f32 -1.442695, %v4881_v5 }
 0x7e8   : > { %3344 = vmatprep.subr.bf16.mxu0 %v5125_v27 }
 0x7e9   : > { %3665 = vpow2.f32 %v3052_v19 }
 0x7eb   : > { %3345 = vmatpush3.bf16.msra.mxu0 %v4726_v21  ;;  %v5228_v21 = vld [vmem:[#allocation53_spill] sm:$0xff] }
 0x7ec   : > { %v862_v62 = vadd.f32 %v5228_v21, %v4145_v59 }
 0x7ee   : > { %3347 = vmatmul.mubr.bf16.vlgmr.msra.gmra.mxu0 %v2486_v24 }
 0x7f2   : > { %v3662_v44 = vpop.eup %3661 }
 0x7f3   : > { %v3664_v18 = vpop.eup %3663  ;;  %v2706_v50 = vsub.f32 1.0, %v3662_v44  ;;  %v2702_v15 = vmul.f32 %v3662_v44, %v4757_v48 }
 0x7f4   : > { %v2707_v58 = vsub.f32 1.0, %v3664_v18  ;;  %v2703_v17 = vmul.f32 %v3664_v18, %v4763_v63 }
 0x7f6   : > { %v3666_v45 = vpop.eup %3665 }
 0x7f7   : > { %v2447_v38 = vadd.f32 1.0, %v3666_v45 }
 0x88e   : > { %v3162_v25 = vpop.f32.mrf.mxu0 }
 0x890   : > { %v3163_v32 = vpop.f32.mrf.mxu0 }
 0x891   : > { %v3164_v39 = vadd.f32 %v3163_v32, %v3162_v25 }
 0x892   : > { %v3165_v14 = vpop.f32.mrf.mxu0 }
 0x894   : > { %v3166_v27 = vpop.f32.mrf.mxu0 }
 0x895   : > { %v2646_v8 = vpop.f32.mrf.mxu1  ;;  %v3167_v10 = vadd.f32 %v3166_v27, %v3165_v14 }
 0x896   : > { %v2647_v55 = vadd.f32 %v3164_v39, %v2646_v8 }
 0x897   : > { %v3328_v22 = vpop.f32.mrf.mxu1 }
 0x898   : > { %v2694_v36 = vadd.f32 %v2647_v55, %v862_v62 }
 0x899   : > { %v2649_v41 = vpop.f32.mrf.mxu1 }
 0x89a   : > { %3667 = vtanh.f32 %v2694_v36  ;;  %v2650_v5 = vadd.f32 %v3167_v10, %v2649_v41 }
 0x89b   : > { %v3329_v16 = vpop.f32.mrf.mxu1  ;;  %3669 = vpow2.f32 %v3053_v9 }
 0x89c   : > { %v2695_v30 = vadd.f32 %v2650_v5, %v865_v40 }
 0x89e   : > { %3671 = vtanh.f32 %v2695_v30 }
 0x89f   : > { %3673 = vrcp.f32 %v2447_v38 }
 0x8a7   : > { %v3668_v43 = vpop.eup %3667 }
 0x8a8   : > { %v2710_v47 = vmul.f32 %v3668_v43, %v2706_v50  ;;  %v3670_v42 = vpop.eup %3669 }
 0x8a9   : > { %v2448_v1 = vadd.f32 1.0, %v3670_v42 }
 0x8aa   : > { %v2714_v13 = vadd.f32 %v2710_v47, %v2702_v15 }
 0x8ab   : > { %v3672_v12 = vpop.eup %3671  ;;  %3675 = vrcp.f32 %v2448_v1 }
 0x8ac   : > { %3060 = vst.msk [vmem:[%s4080_s26 + $0x10] sm:$0xff] %vm2192_vm7, %v2714_v13  ;;  %2723 = vst [vmem:[#allocation3 + $0x10] sm:$0xff] %v2714_v13  ;;  %v2711_v49 = vmul.f32 %v3672_v12, %v2707_v58  ;;  %v3674_v31 = vpop.eup %3673 }
 0x8ad   : > { %2727 = vst.msk [vmem:[#allocation14] sm:$0xff] %vm2192_vm7, %v2714_v13  ;;  %v2708_v4 = vsub.f32 1.0, %v3674_v31  ;;  %v2704_v60 = vmul.f32 %v3674_v31, %v4795_v23 }
 0x8ae   : > { %v2715_v48 = vadd.f32 %v2711_v49, %v2703_v17  ;;  %v2687_v53 = vpop.f32.mrf.mxu0 }
 0x8af   : > { %v2696_v61 = vadd.f32 %v2687_v53, %v1010_v29 }
 0x8b0   : > { %3061 = vst.msk [vmem:[%s4080_s26 + $0x18] sm:$0xff] %vm2192_vm7, %v2715_v48  ;;  %2724 = vst [vmem:[#allocation3] sm:$0xff] %v2715_v48  ;;  %v3348_v24 = vpop.f32.mrf.mxu0 }
 0x8b1   : > { %2728 = vst.msk [vmem:[#allocation14 + $0x8] sm:$0xff] %vm2192_vm7, %v2715_v48  ;;  %3677 = vtanh.f32 %v2696_v61 }
 0x8b2   : > { %v2690_v63 = vpop.f32.mrf.mxu0 }
 0x8b3   : > { %v2697_v3 = vadd.f32 %v2690_v63, %v1013_v26 }
 0x8b4   : > { %v3349_v54 = vpop.f32.mrf.mxu0 }
 0x8b5   : > { %3679 = vtanh.f32 %v2697_v3 }
 0x8b8   : > { %v3676_v56 = vpop.eup %3675 }
 0x8b9   : > { %v2709_v51 = vsub.f32 1.0, %v3676_v56  ;;  %v2705_v59 = vmul.f32 %v3676_v56, %v4803_v7 }
 0x8be   : > { %v3678_v11 = vpop.eup %3677 }
 0x8bf   : > { %v2712_v0 = vmul.f32 %v3678_v11, %v2708_v4 }
 0x8c1   : > { %v2716_v46 = vadd.f32 %v2712_v0, %v2704_v60 }
 0x8c2   : > { %v3680_v35 = vpop.eup %3679 }
 0x8c3   : > { %3062 = vst.msk [vmem:[%s4080_s26 + $0x30] sm:$0xff] %vm2192_vm7, %v2716_v46  ;;  %2725 = vst [vmem:[#allocation3 + $0x18] sm:$0xff] %v2716_v46  ;;  %v2713_v57 = vmul.f32 %v3680_v35, %v2709_v51 }
 0x8c4   : > { %2729 = vst.msk [vmem:[#allocation14 + $0x10] sm:$0xff] %vm2192_vm7, %v2716_v46 }
 0x8c5   : > { %v2717_v33 = vadd.f32 %v2713_v57, %v2705_v59 }
 0x8c7   : > { %3063 = vst.msk [vmem:[%s4080_s26 + $0x38] sm:$0xff] %vm2192_vm7, %v2717_v33  ;;  %2726 = vst [vmem:[#allocation3 + $0x8] sm:$0xff] %v2717_v33 }
 0x8c8   : > { %2730 = vst.msk [vmem:[#allocation14 + $0x18] sm:$0xff] %vm2192_vm7, %v2717_v33 }
 0x8c9   : > { %s3075_s18 = sshll.u32 %s3965_s17, 9  ;;  %s2756_s2 = sshll.u32 %s4080_s26, 4  ;;  %s2757_s2 = int_to_ptr.vmem [resolvable:$true] %s2756_s2 }
 0x8ca   : > { %s2745_s27 = scalar_lea.hbm %s5021_s9, %s3075_s18  ;;  %s3880_s12 = smov 512  }
 0x8cb   : > { %p5232_p3 = scmp.ne.s32.totalorder %s5087_s24, 0  ;;  %s3881_s22 = smov 2048  }
 0x8cc   : > { %s3882_s30 = smov 4   ;;  %s3883_s11 = smov 128  }
 0x8cd   : > { %3368 = sst [smem:[#allocation17]] (%p5232_p3), %s3880_s12  ;;  %s3884_s26 = smov 8  }
 0x8ce   : > { %3369 = sst [smem:[#allocation17 + $0x1]] (%p5232_p3), %s3881_s22  ;;  %s3885_s28 = smov 131072  }
 0x8cf   : > { %3370 = sst [smem:[#allocation17 + $0x2]] (%p5232_p3), %s3882_s30  ;;  %s3886_s18 = smov 0  }
 0x8d0   : > { %3371 = sst [smem:[#allocation17 + $0x3]] (%p5232_p3), %s3883_s11  ;;  %s3887_s23 = smov [#allocation14]  }
 0x8d1   : > { %3372 = sst [smem:[#allocation17 + $0x4]] (%p5232_p3), %s3883_s11  ;;  %s2782_s20 = sshll.u32 %s3887_s23, 4  ;;  %s2783_s20 = int_to_ptr.vmem [resolvable:$true] %s2782_s20 }
 0x8d2   : > { %3373 = sst [smem:[#allocation17 + $0x5]] (%p5232_p3), %s3884_s26  ;;  %s3787_s12 = scalar_lea.vmem %s2783_s20, 512 }
 0x8d3   : > { %3374 = dma.general (%p5232_p3), %s2757_s2, 1024, %s2745_s27, %s2732_s29, %s3885_s28, [#allocation17], %s3886_s18, 0  }
 0x8d4   : > { %p3788_p10 = scmp.ne.s32.totalorder %s2783_s20, %s3787_s12  ;;  %p5233_p12 = scmp.eq.s32.totalorder %s3965_s17, 3 }
 0x8d5   : > { %p3794_p8 = scmp.lt.s32.totalorder %s2783_s20, %s2783_s20  ;;  %p3795_p9 = scmp.lt.s32.totalorder %s3787_s12, %s3787_s12 }
 0x8d6   : > { %p3789_p6 = pnand %p3788_p10, %p5233_p12 }
 0x8d7   : > { %p3796_p5 = por %p3795_p9, %p3794_p8 }
 0x8d8   : > { %p3790_p11 = pneg %p3789_p6 }
 0x8da   : > { %p3797_p1 = pnand %p3796_p5, %p3790_p11 }
 0x8dc   : > { %3800 = shalt.err (!%p3797_p1)
}
 0x8dd   : > { %s3888_s22 = smov 128   ;;  %p5234_p2 = pmov %p5233_p12 }
 0x8df   : > { %3376 = dma.vmem_to_hbm [thread:$0]  (%p5234_p2), %s2783_s20, 512, %s5022_s10, [#allocation15], %s3888_s22, %s3888_s22, %s3879_s21  }
 0x8e0   : > { %p5235_p0 = pmov %p5234_p2 }
 0x8e2   : > { %3840 = dma.done.wait (%p5235_p0), [#allocation15], 512   ;;  %p5236_p13 = pmov %p5235_p0 }
 0x8e4   : > { %3842 = vsyncadd (%p5236_p13), [#allocation15], 4294966784 }
 0x8e5 PF: > { %p3407_p4 = scmp.ge.s32.totalorder %s3861_s16, 2  ;;  %s2801_s2 = sand.u32 1, %s3849_s13  }
 0x8e6   : > { %p5237_p7 = scmp.ne.s32.totalorder %s5088_s25, 0  ;;  %s2802_s27 = scalar_lea.sflag [#allocation7], %s2801_s2 }
 0x8e8   : > { %p3394_p3 = pnand %p3407_p4, %p5237_p7 }
 0x8ea   : > { %p3395_p10 = pneg %p3394_p3 }
 0x8ec   : > { %3844 = dma.done.wait (%p3395_p10), %s2802_s27, 1024  }
 0x8ed   : > { %3846 = vsyncadd (%p3395_p10), %s2802_s27, 4294966272  ;;  %s5238_s21 = sld [smem:[#allocation23_spill]]  ;;  %p25_p12 = scmp.ge.s32.totalorder %s3969_s19, 6  }
 0x8ee   : > { %s5239_s13 = smov %s3853_s14  ;;  %s5240_s14 = smov %s3857_s15 }
 0x8ef   : > { %s5242_s16 = smov %s3969_s19  ;;  %27 = sbr.rel (!%p25_p12) target bundleno = 9 (0x9), region = 170 }
 0x8f3   : > { %s5241_s15 = smov %s5238_s21 }
 0x8f4   :  { %2807 = vsyncpa [#allocation6], 1 }
 0x8f5   :  { %2809 = vsyncpa [#allocation6 + $0x1], 1 }
 0x8f6   :  { %2810 = vsyncpa [#allocation9], 1 }
 0x8f7   :  { %2811 = vsyncpa [#allocation12], 1 }
 0x8f8   :  { %2812 = vsyncpa [#allocation7], 1 }
 0x8f9   :  { %2814 = vsyncpa [#allocation7 + $0x1], 1 }
 0x8fa   :  { %2815 = vsyncpa [#allocation15], 1 }

</bundles_post_ra>
